<compile_context>
chip_gen: v7x
topology: tpu7x:2x2x1
jax: 0.10.0
libtpu: 0.0.40
codegen_flags: <defaults>
</compile_context>

<pallas_src>
import functools

import numpy as np
import jax
import jax.numpy as jnp
from jax.experimental import pallas as pl
from jax.experimental.pallas import tpu as pltpu

H1 = 256
H2 = 32
LANE = 128          # TPU lane width -> lane-dense (padded) class block
MAX_TILE_B = 2048   # default cap on the batch tile (review: 1024-2048)
_TILE_QUANTUM = 256
NEG_BIG = -1e30     # effectively -inf for softmax masking (exp underflows to 0)


def _round_up(x, m):
    return (x + m - 1) // m * m


def _choose_tile_b(batch, max_tile_b):
    """Pick a batch tile: big enough to amortize per-step overhead, capped at
    max_tile_b, and (for large batches) preferring an even number of grid
    steps so both v7x TensorCores get equal work."""
    tile = min(max(_TILE_QUANTUM, _round_up(batch, _TILE_QUANTUM)), max_tile_b)
    steps = -(-batch // tile)
    if steps > 1 and steps % 2 == 1:
        alt = min(max(_round_up(-(-batch // (steps + 1)), _TILE_QUANTUM),
                      _TILE_QUANTUM), max_tile_b)
        if (-(-batch // alt)) % 2 == 0:
            tile = alt
    return tile


def fcnet_kernel(x_ref, w1_ref, b1_ref, w2_ref, b2_ref, w3_ref, b3_ref, o_ref,
                 *, num_classes):
    # x_ref: (TB, D) f32; weights: bf16 (in, out); biases: f32 (1, out).
    # All GEMMs accumulate in f32 on the MXU; elementwise work stays f32.
    x = x_ref[...].astype(w1_ref.dtype)   # bf16 cast in-kernel (MXU operand)
    h1 = jnp.dot(x, w1_ref[...], preferred_element_type=jnp.float32) + b1_ref[...]
    h1 = jnp.maximum(h1, 0.0)
    h2 = jnp.dot(h1.astype(w2_ref.dtype), w2_ref[...],
                 preferred_element_type=jnp.float32) + b2_ref[...]
    h2 = jnp.maximum(h2, 0.0)
    z = jnp.dot(h2.astype(w3_ref.dtype), w3_ref[...],
                preferred_element_type=jnp.float32) + b3_ref[...]
    z = jnp.maximum(z, 0.0)
    # Mask padded class lanes AFTER the ReLU (ReLU would turn -inf into a
    # valid 0 logit) so they contribute nothing to the softmax.
    col = jax.lax.broadcasted_iota(jnp.int32, z.shape, 1)
    z = jnp.where(col < num_classes, z, NEG_BIG)
    z = z - jnp.max(z, axis=-1, keepdims=True)
    e = jnp.exp(z)
    p = e * pl.reciprocal(jnp.sum(e, axis=-1, keepdims=True), approx=True)
    o_ref[...] = p.astype(o_ref.dtype)


def prepare_params(params):
    """One-time weight preparation (cast to bf16, pad the class dim to a
    lane-dense 128 multiple).  Do this once, not per forward call."""
    w1, b1, w2, b2, w3, b3 = params
    num_classes = int(w3.shape[1])
    n_pad = _round_up(max(num_classes, LANE), LANE)
    w1_p = w1.astype(jnp.bfloat16)
    w2_p = w2.astype(jnp.bfloat16)
    w3_p = jnp.zeros((w3.shape[0], n_pad), jnp.bfloat16).at[:, :num_classes].set(
        w3.astype(jnp.bfloat16))
    b1_p = jnp.asarray(b1, jnp.float32).reshape(1, -1)
    b2_p = jnp.asarray(b2, jnp.float32).reshape(1, -1)
    b3_p = jnp.zeros((1, n_pad), jnp.float32).at[:, :num_classes].set(
        jnp.asarray(b3, jnp.float32).reshape(1, -1))
    return (w1_p, b1_p, w2_p, b2_p, w3_p, b3_p), num_classes


def fcnet_forward(x, prepared, num_classes, *, max_tile_b=MAX_TILE_B,
                  out_dtype=jnp.bfloat16, slice_classes=True):
    w1_p, b1_p, w2_p, b2_p, w3_p, b3_p = prepared
    B, D = x.shape
    n_pad = int(w3_p.shape[1])
    out_isz = int(np.dtype(out_dtype).itemsize)

    tile_b = _choose_tile_b(B, max_tile_b)
    grid = (pl.cdiv(B, tile_b),)

    def resident(shape):
        # Same (0,...,0) block at every grid step -> stays VMEM-resident.
        return pl.BlockSpec(shape, lambda i: tuple(0 for _ in shape))

    weight_bytes = ((w1_p.size + w2_p.size + w3_p.size) * 2
                    + (b1_p.size + b2_p.size + b3_p.size) * 4)
    flops = 2 * B * (D * H1 + H1 * H2 + H2 * n_pad)
    bytes_accessed = B * D * 4 + weight_bytes + B * n_pad * out_isz

    # VMEM budget: double-buffered x/out tiles + resident weights + f32 temps.
    vmem_est = (2 * tile_b * D * 4 + 2 * tile_b * n_pad * out_isz
                + 2 * weight_bytes
                + tile_b * (H1 + H2 + 2 * n_pad) * 4)
    compiler_kwargs = {}
    if vmem_est > 24 * 1024 * 1024:
        # Only needed for very large tiles (v7x: 32 MiB scoped / 64 MiB phys).
        compiler_kwargs["vmem_limit_bytes"] = min(int(vmem_est * 3 // 2),
                                                  60 * 1024 * 1024)

    out = pl.pallas_call(
        functools.partial(fcnet_kernel, num_classes=num_classes),
        out_shape=jax.ShapeDtypeStruct((B, n_pad), out_dtype),
        grid=grid,
        in_specs=[
            pl.BlockSpec((tile_b, D), lambda i: (i, 0)),   # x: tiled over batch
            resident(w1_p.shape), resident(b1_p.shape),
            resident(w2_p.shape), resident(b2_p.shape),
            resident(w3_p.shape), resident(b3_p.shape),
        ],
        out_specs=pl.BlockSpec((tile_b, n_pad), lambda i: (i, 0)),
        compiler_params=pltpu.CompilerParams(
            dimension_semantics=("parallel",), **compiler_kwargs),
        cost_estimate=pl.CostEstimate(
            flops=flops,
            transcendentals=B * n_pad,
            bytes_accessed=bytes_accessed),
    )(x.astype(jnp.float32), w1_p, b1_p, w2_p, b2_p, w3_p, b3_p)

    if slice_classes:
        # NOTE: this slice costs an extra read+write of the padded output when
        # XLA cannot fuse it into the consumer.  Pass slice_classes=False and
        # slice at the consumer to avoid that pass.
        return out[:, :num_classes]
    return out


def init_params(key, input_size, num_classes):
    # Deterministic synthetic init (shapes match FcNet.__init__); stored (in, out).
    k1, k2, k3, k4, k5, k6 = jax.random.split(key, 6)

    def lin(kw, kb, fan_in, fan_out):
        bound = 1.0 / jnp.sqrt(fan_in)
        w = jax.random.uniform(kw, (fan_in, fan_out), jnp.float32, -bound, bound)
        b = jax.random.uniform(kb, (1, fan_out), jnp.float32, -bound, bound)
        return w, b

    w1, b1 = lin(k1, k2, input_size, H1)
    w2, b2 = lin(k3, k4, H1, H2)
    w3, b3 = lin(k5, k6, H2, num_classes)
    return (w1, b1, w2, b2, w3, b3)


def reference_forward_f32(x, params):
    w1, b1, w2, b2, w3, b3 = params
    h = jnp.maximum(x @ w1 + b1, 0.0)
    h = jnp.maximum(h @ w2 + b2, 0.0)
    z = jnp.maximum(h @ w3 + b3, 0.0)
    return jax.nn.softmax(z, axis=-1)


def reference_forward_mixed(x, params):
    # Mirrors the kernel's mixed precision: bf16 MXU operands, f32 accumulate.
    w1, b1, w2, b2, w3, b3 = params
    bf = jnp.bfloat16
    dot = lambda a, b: jnp.dot(a.astype(bf), b.astype(bf),
                               preferred_element_type=jnp.float32)
    h = jnp.maximum(dot(x, w1) + b1, 0.0)
    h = jnp.maximum(dot(h, w2) + b2, 0.0)
    z = jnp.maximum(dot(h, w3) + b3, 0.0)
    return jax.nn.softmax(z, axis=-1)


if __name__ == "__main__":
    key = jax.random.PRNGKey(0)
    kx, kp, kx2 = jax.random.split(key, 3)
    batch, input_size, num_classes = 2, 64, 10
    x = jax.random.normal(kx, (batch, input_size), jnp.float32)
    params = init_params(kp, input_size, num_classes)
    prepared, n_cls = prepare_params(params)   # one-time weight prep

    out = jax.block_until_ready(fcnet_forward(x, prepared, n_cls))
    assert out.shape == (batch, num_classes)
    out32 = out.astype(jnp.float32)

    # Tight check vs a reference with identical mixed precision (bf16 operands,
    # bf16 output store, approx reciprocal -> relaxed from 1e-5).
    ref_mixed = reference_forward_mixed(x, params)
    assert jnp.allclose(out32, ref_mixed, atol=1e-2, rtol=2e-2)
    # Loose sanity check vs the pure-f32 PyTorch-equivalent forward.
    ref_f32 = reference_forward_f32(x, params)
    assert jnp.allclose(out32, ref_f32, atol=5e-2, rtol=5e-2)
    # Rows are (approximately) normalized probabilities.
    assert jnp.allclose(jnp.sum(out32, axis=-1), 1.0, atol=1e-2)
    assert bool(jnp.all(out32 >= 0.0))

    # Exercise the multi-step grid + clipped partial last block path
    # (B not a multiple of the tile; small max_tile_b forces grid > 1).
    B2 = 600
    x2 = jax.random.normal(kx2, (B2, input_size), jnp.float32)
    out2 = jax.block_until_ready(
        fcnet_forward(x2, prepared, n_cls, max_tile_b=256)).astype(jnp.float32)
    assert out2.shape == (B2, num_classes)
    ref2 = reference_forward_mixed(x2, params)
    assert jnp.allclose(out2, ref2, atol=1e-2, rtol=2e-2)
    assert jnp.allclose(jnp.sum(out2, axis=-1), 1.0, atol=1e-2)

    print("KERNEL_OK")
</pallas_src>

<mosaic_0001>
module attributes {stable_mosaic.version = 11 : i64} {
  func.func @fcnet_kernel(%arg0: i32, %arg1: memref<256x64xf32, #tpu.memory_space<vmem>>, %arg2: memref<64x256xbf16, #tpu.memory_space<vmem>>, %arg3: memref<1x256xf32, #tpu.memory_space<vmem>>, %arg4: memref<256x32xbf16, #tpu.memory_space<vmem>>, %arg5: memref<1x32xf32, #tpu.memory_space<vmem>>, %arg6: memref<32x128xbf16, #tpu.memory_space<vmem>>, %arg7: memref<1x128xf32, #tpu.memory_space<vmem>>, %arg8: memref<256x128xbf16, #tpu.memory_space<vmem>>) attributes {dimension_semantics = [#tpu.dimension_semantics<parallel>], iteration_bounds = array<i64: 1>, scalar_prefetch = 0 : i64, scratch_operands = 0 : i64, tpu.core_type = #tpu.core_type<tc>, window_params = [{transform_indices = @transform_0, window_bounds = array<i64: 256, 64>}, {pipeline_mode = #tpu.pipeline_mode<synchronous>, transform_indices = @transform_1, window_bounds = array<i64: 64, 256>}, {pipeline_mode = #tpu.pipeline_mode<synchronous>, transform_indices = @transform_2, window_bounds = array<i64: 1, 256>}, {pipeline_mode = #tpu.pipeline_mode<synchronous>, transform_indices = @transform_3, window_bounds = array<i64: 256, 32>}, {pipeline_mode = #tpu.pipeline_mode<synchronous>, transform_indices = @transform_4, window_bounds = array<i64: 1, 32>}, {pipeline_mode = #tpu.pipeline_mode<synchronous>, transform_indices = @transform_5, window_bounds = array<i64: 32, 128>}, {pipeline_mode = #tpu.pipeline_mode<synchronous>, transform_indices = @transform_6, window_bounds = array<i64: 1, 128>}, {transform_indices = @transform_7, window_bounds = array<i64: 256, 128>}]} {
    %c0 = arith.constant 0 : index
    %c0_0 = arith.constant 0 : index
    %0 = vector.load %arg1[%c0, %c0_0] : memref<256x64xf32, #tpu.memory_space<vmem>>, vector<256x64xf32>
    %1 = arith.truncf %0 : vector<256x64xf32> to vector<256x64xbf16>
    %c0_1 = arith.constant 0 : index
    %c0_2 = arith.constant 0 : index
    %2 = vector.load %arg2[%c0_1, %c0_2] : memref<64x256xbf16, #tpu.memory_space<vmem>>, vector<64x256xbf16>
    %cst = arith.constant dense<0.000000e+00> : vector<256x256xf32>
    %3 = tpu.matmul %1, %2, %cst {dimension_numbers = #tpu.dot_dimension_numbers<[1], [0], [0], [1], [0, 0, 1, 1], [], []>} : vector<256x64xbf16>, vector<64x256xbf16>, vector<256x256xf32> -> vector<256x256xf32>
    %c0_3 = arith.constant 0 : index
    %c0_4 = arith.constant 0 : index
    %4 = vector.load %arg3[%c0_3, %c0_4] : memref<1x256xf32, #tpu.memory_space<vmem>>, vector<1x256xf32>
    %5 = vector.broadcast %4 : vector<1x256xf32> to vector<256x256xf32>
    %6 = arith.addf %3, %5 : vector<256x256xf32>
    %cst_5 = arith.constant 0.000000e+00 : f32
    %7 = vector.broadcast %cst_5 : f32 to vector<256x256xf32>
    %8 = arith.maximumf %6, %7 : vector<256x256xf32>
    %9 = arith.truncf %8 : vector<256x256xf32> to vector<256x256xbf16>
    %c0_6 = arith.constant 0 : index
    %c0_7 = arith.constant 0 : index
    %10 = vector.load %arg4[%c0_6, %c0_7] : memref<256x32xbf16, #tpu.memory_space<vmem>>, vector<256x32xbf16>
    %cst_8 = arith.constant dense<0.000000e+00> : vector<256x32xf32>
    %11 = tpu.matmul %9, %10, %cst_8 {dimension_numbers = #tpu.dot_dimension_numbers<[1], [0], [0], [1], [0, 0, 1, 1], [], []>} : vector<256x256xbf16>, vector<256x32xbf16>, vector<256x32xf32> -> vector<256x32xf32>
    %c0_9 = arith.constant 0 : index
    %c0_10 = arith.constant 0 : index
    %12 = vector.load %arg5[%c0_9, %c0_10] : memref<1x32xf32, #tpu.memory_space<vmem>>, vector<1x32xf32>
    %13 = vector.broadcast %12 : vector<1x32xf32> to vector<256x32xf32>
    %14 = arith.addf %11, %13 : vector<256x32xf32>
    %cst_11 = arith.constant 0.000000e+00 : f32
    %15 = vector.broadcast %cst_11 : f32 to vector<256x32xf32>
    %16 = arith.maximumf %14, %15 : vector<256x32xf32>
    %17 = arith.truncf %16 : vector<256x32xf32> to vector<256x32xbf16>
    %c0_12 = arith.constant 0 : index
    %c0_13 = arith.constant 0 : index
    %18 = vector.load %arg6[%c0_12, %c0_13] : memref<32x128xbf16, #tpu.memory_space<vmem>>, vector<32x128xbf16>
    %cst_14 = arith.constant dense<0.000000e+00> : vector<256x128xf32>
    %19 = tpu.matmul %17, %18, %cst_14 {dimension_numbers = #tpu.dot_dimension_numbers<[1], [0], [0], [1], [0, 0, 1, 1], [], []>} : vector<256x32xbf16>, vector<32x128xbf16>, vector<256x128xf32> -> vector<256x128xf32>
    %c0_15 = arith.constant 0 : index
    %c0_16 = arith.constant 0 : index
    %20 = vector.load %arg7[%c0_15, %c0_16] : memref<1x128xf32, #tpu.memory_space<vmem>>, vector<1x128xf32>
    %21 = vector.broadcast %20 : vector<1x128xf32> to vector<256x128xf32>
    %22 = arith.addf %19, %21 : vector<256x128xf32>
    %cst_17 = arith.constant 0.000000e+00 : f32
    %23 = vector.broadcast %cst_17 : f32 to vector<256x128xf32>
    %24 = arith.maximumf %22, %23 : vector<256x128xf32>
    %25 = tpu.iota {dimensions = array<i32: 1>} : vector<256x128xi32>
    %c10_i32 = arith.constant 10 : i32
    %26 = vector.broadcast %c10_i32 : i32 to vector<256x128xi32>
    %27 = arith.cmpi slt, %25, %26 : vector<256x128xi32>
    %cst_18 = arith.constant -1.000000e+30 : f32
    %28 = vector.broadcast %cst_18 : f32 to vector<256x128xf32>
    %29 = arith.select %27, %24, %28 : vector<256x128xi1>, vector<256x128xf32>
    %cst_19 = arith.constant dense<0xFF800000> : vector<256xf32>
    %30 = vector.multi_reduction <maximumf>, %29, %cst_19 [1] : vector<256x128xf32> to vector<256xf32>
    %31 = vector.shape_cast %30 : vector<256xf32> to vector<256x1xf32>
    %32 = vector.broadcast %31 : vector<256x1xf32> to vector<256x128xf32>
    %33 = arith.subf %29, %32 : vector<256x128xf32>
    %34 = math.exp %33 : vector<256x128xf32>
    %cst_20 = arith.constant dense<0.000000e+00> : vector<256xf32>
    %35 = vector.multi_reduction <add>, %34, %cst_20 [1] : vector<256x128xf32> to vector<256xf32>
    %36 = vector.shape_cast %35 : vector<256xf32> to vector<256x1xf32>
    %37 = tpu.reciprocal %36 {approx = true} : vector<256x1xf32> -> vector<256x1xf32>
    %38 = vector.broadcast %37 : vector<256x1xf32> to vector<256x128xf32>
    %39 = arith.mulf %34, %38 : vector<256x128xf32>
    %40 = arith.truncf %39 : vector<256x128xf32> to vector<256x128xbf16>
    %c0_21 = arith.constant 0 : index
    %c0_22 = arith.constant 0 : index
    %41 = vector.load %arg8[%c0_21, %c0_22] : memref<256x128xbf16, #tpu.memory_space<vmem>>, vector<256x128xbf16>
    tpu.vector_store %arg8[%c0_21, %c0_22], %40 {strides = array<i32>} : memref<256x128xbf16, #tpu.memory_space<vmem>>, vector<256x128xbf16>,
    return
  }
  func.func @transform_0(%arg0: i32) -> (i32, i32) {
    %c0_i32 = arith.constant 0 : i32
    %c0_i32_0 = arith.constant 0 : i32
    return %arg0, %c0_i32 : i32, i32
  }
  func.func @transform_1(%arg0: i32) -> (i32, i32) {
    %c0_i32 = arith.constant 0 : i32
    %c0_i32_0 = arith.constant 0 : i32
    %c0_i32_1 = arith.constant 0 : i32
    return %c0_i32, %c0_i32_0 : i32, i32
  }
  func.func @transform_2(%arg0: i32) -> (i32, i32) {
    %c0_i32 = arith.constant 0 : i32
    %c0_i32_0 = arith.constant 0 : i32
    %c0_i32_1 = arith.constant 0 : i32
    return %c0_i32, %c0_i32_0 : i32, i32
  }
  func.func @transform_3(%arg0: i32) -> (i32, i32) {
    %c0_i32 = arith.constant 0 : i32
    %c0_i32_0 = arith.constant 0 : i32
    %c0_i32_1 = arith.constant 0 : i32
    return %c0_i32, %c0_i32_0 : i32, i32
  }
  func.func @transform_4(%arg0: i32) -> (i32, i32) {
    %c0_i32 = arith.constant 0 : i32
    %c0_i32_0 = arith.constant 0 : i32
    %c0_i32_1 = arith.constant 0 : i32
    return %c0_i32, %c0_i32_0 : i32, i32
  }
  func.func @transform_5(%arg0: i32) -> (i32, i32) {
    %c0_i32 = arith.constant 0 : i32
    %c0_i32_0 = arith.constant 0 : i32
    %c0_i32_1 = arith.constant 0 : i32
    return %c0_i32, %c0_i32_0 : i32, i32
  }
  func.func @transform_6(%arg0: i32) -> (i32, i32) {
    %c0_i32 = arith.constant 0 : i32
    %c0_i32_0 = arith.constant 0 : i32
    %c0_i32_1 = arith.constant 0 : i32
    return %c0_i32, %c0_i32_0 : i32, i32
  }
  func.func @transform_7(%arg0: i32) -> (i32, i32) {
    %c0_i32 = arith.constant 0 : i32
    %c0_i32_0 = arith.constant 0 : i32
    return %arg0, %c0_i32 : i32, i32
  }
}

</mosaic_0001>

<bundles_post_ra>
// kernel: tpu_custom_call.1
= control target key start
LH: loop header
LB: loop body
LE: loop exit
PB: predicated region body
PF: predicated region fallthrough
CT: control target
= control target key end

     0   :  { %12 = vsyncpa [#allocation3], 0  ;;  %v2995_v2 = vmov 0   ;;  %vm136_vm0 = vcmask 523264   ;;  %vm841_vm1 = vcmask 261120   ;;  %s3871_s0 = inlined_call_operand.vmem [shape: f32[2,64], index: 0, kind: input, shape index: {}]   ;;  %s3872_s1 = inlined_call_operand.vmem [shape: bf16[64,256], index: 1, kind: input, shape index: {}]   ;;  %s3873_s2 = inlined_call_operand.vmem [shape: f32[1,256], index: 2, kind: input, shape index: {}]   ;;  %s3874_s3 = inlined_call_operand.vmem [shape: bf16[256,32], index: 3, kind: input, shape index: {}]   ;;  %s3875_s4 = inlined_call_operand.vmem [shape: f32[1,32], index: 4, kind: input, shape index: {}]   ;;  %s3876_s5 = inlined_call_operand.vmem [shape: bf16[32,128], index: 5, kind: input, shape index: {}]   ;;  %s3877_s6 = inlined_call_operand.vmem [shape: f32[1,128], index: 6, kind: input, shape index: {}]   ;;  %s3878_s7 = inlined_call_operand.hbm [shape: bf16[2,128], index: 7, kind: output, shape index: {}]  }
   0x1   :  { %v2813_v0 = vld [vmem:[%s3872_s1 + $0x4] ss:$8 sps:$4 sm:$0xff]   ;;  %v2815_v1 = vld [vmem:[%s3872_s1] ss:$8 sps:$4 sm:$0xff]   ;;  %217 = vmatprep.mubr.bf16.mxu0 %v2995_v2  ;;  %337 = vmatprep.mubr.bf16.mxu1 %v2995_v2  ;;  %v2816_v3 = vld [vmem:[%s3872_s1 + $0x14] ss:$8 sps:$4 sm:$0xff]  }
   0x2   :  { %185 = vmatprep.subr.bf16.mxu0 %v2813_v0  ;;  %2800 = vmatprep.subr.bf16.mxu1 %v2813_v0  ;;  %v2818_v4 = vld [vmem:[%s3872_s1 + $0x10] ss:$8 sps:$4 sm:$0xff]   ;;  %v2819_v5 = vld [vmem:[%s3872_s1 + $0x24] ss:$8 sps:$4 sm:$0xff]   ;;  %v2821_v6 = vld [vmem:[%s3872_s1 + $0x20] ss:$8 sps:$4 sm:$0xff]  }
   0x3   :  { %186 = vmatpush1.bf16.msra.mxu0 %v2815_v1  ;;  %2804 = vmatpush1.bf16.msra.mxu1 %v2815_v1  ;;  %v2822_v7 = vld [vmem:[%s3872_s1 + $0x34] ss:$8 sps:$4 sm:$0xff]   ;;  %v2824_v8 = vld [vmem:[%s3872_s1 + $0x30] ss:$8 sps:$4 sm:$0xff]   ;;  %v28_v9 = vld [vmem:[%s3871_s0] sm:$0xff] }
   0x4   :  { %187 = vmatprep.subr.bf16.mxu0 %v2816_v3  ;;  %2801 = vmatprep.subr.bf16.mxu1 %v2816_v3  ;;  %v29_v10 = vld [vmem:[%s3871_s0 + $0x8] sm:$0xff]  ;;  %v52_v11 = vld [vmem:[%s3871_s0 + $0xc0] sm:$0xff]  ;;  %v30_v16 = vld [vmem:[%s3871_s0 + $0x10] sm:$0xff] }
   0x5   :  { %v53_v12 = vld [vmem:[%s3871_s0 + $0xc8] sm:$0xff]  ;;  %v60_v13 = vpack.c.bf16 %v29_v10, %v28_v9  ;;  %v2825_v15 = vld [vmem:[%s3874_s3 + $0x40] sm:$0xff]   ;;  %v31_v17 = vld [vmem:[%s3871_s0 + $0x18] sm:$0xff]  ;;  %v86_v9 = vlaneseq }
   0x6   :  { %v72_v14 = vpack.c.bf16 %v53_v12, %v52_v11  ;;  %v54_v18 = vld [vmem:[%s3871_s0 + $0xd0] sm:$0xff]  ;;  %v2826_v19 = vld [vmem:[%s3874_s3] sm:$0xff]   ;;  %v2827_v20 = vld [vmem:[%s3874_s3 + $0x48] sm:$0xff]   ;;  %v61_v23 = vpack.c.bf16 %v31_v17, %v30_v16 }
   0x7   :  { %188 = vmatpush1.bf16.msra.mxu0 %v2818_v4  ;;  %2805 = vmatpush1.bf16.msra.mxu1 %v2818_v4  ;;  %v55_v21 = vld [vmem:[%s3871_s0 + $0xd8] sm:$0xff]  ;;  %v2828_v22 = vld [vmem:[%s3874_s3 + $0x8] sm:$0xff]   ;;  %v2829_v25 = vld [vmem:[%s3874_s3 + $0x50] sm:$0xff]   ;;  %v3241_v10 = vshrl.u32 %v86_v9, 7 }
   0x8   :  { %189 = vmatprep.subr.bf16.mxu0 %v2819_v5  ;;  %2802 = vmatprep.subr.bf16.mxu1 %v2819_v5  ;;  %v73_v24 = vpack.c.bf16 %v55_v21, %v54_v18  ;;  %v32_v26 = vld [vmem:[%s3871_s0 + $0x20] sm:$0xff]  ;;  %v33_v27 = vld [vmem:[%s3871_s0 + $0x28] sm:$0xff]  ;;  %v2830_v29 = vld [vmem:[%s3874_s3 + $0x10] sm:$0xff]  }
   0x9   :  { %v56_v28 = vld [vmem:[%s3871_s0 + $0xe0] sm:$0xff]  ;;  %v2831_v30 = vld [vmem:[%s3874_s3 + $0x58] sm:$0xff]   ;;  %v57_v31 = vld [vmem:[%s3871_s0 + $0xe8] sm:$0xff]  ;;  %v62_v33 = vpack.c.bf16 %v33_v27, %v32_v26  ;;  %v88_v11 = vsub.s32 0, %v3241_v10 }
   0xa   :  { %v2832_v32 = vld [vmem:[%s3874_s3 + $0x18] sm:$0xff]   ;;  %v74_v34 = vpack.c.bf16 %v57_v31, %v56_v28  ;;  %v2833_v35 = vld [vmem:[%s3874_s3 + $0x60] sm:$0xff]   ;;  %v34_v37 = vld [vmem:[%s3871_s0 + $0x30] sm:$0xff] }
   0xb   :  { %190 = vmatpush1.bf16.msra.mxu0 %v2821_v6  ;;  %2806 = vmatpush1.bf16.msra.mxu1 %v2821_v6  ;;  %v2834_v36 = vld [vmem:[%s3874_s3 + $0x20] sm:$0xff]   ;;  %v2835_v38 = vld [vmem:[%s3874_s3 + $0x68] sm:$0xff]   ;;  %v35_v39 = vld [vmem:[%s3871_s0 + $0x38] sm:$0xff] }
   0xc   :  { %191 = vmatprep.subr.bf16.mxu0 %v2822_v7  ;;  %2803 = vmatprep.subr.bf16.mxu1 %v2822_v7  ;;  %v58_v40 = vld [vmem:[%s3871_s0 + $0xf0] sm:$0xff]  ;;  %v59_v41 = vld [vmem:[%s3871_s0 + $0xf8] sm:$0xff]  ;;  %v2836_v42 = vld [vmem:[%s3874_s3 + $0x28] sm:$0xff]   ;;  %v63_v43 = vpack.c.bf16 %v35_v39, %v34_v37 }
   0xd   :  { %v75_v44 = vpack.c.bf16 %v59_v41, %v58_v40  ;;  %v36_v45 = vld [vmem:[%s3871_s0 + $0x40] sm:$0xff]  ;;  %v37_v46 = vld [vmem:[%s3871_s0 + $0x48] sm:$0xff]  ;;  %v38_v48 = vld [vmem:[%s3871_s0 + $0x50] sm:$0xff] }
   0xe   :  { %v64_v47 = vpack.c.bf16 %v37_v46, %v36_v45  ;;  %v39_v49 = vld [vmem:[%s3871_s0 + $0x58] sm:$0xff]  ;;  %v40_v51 = vld [vmem:[%s3871_s0 + $0x60] sm:$0xff]  ;;  %v41_v52 = vld [vmem:[%s3871_s0 + $0x68] sm:$0xff] }
   0xf   :  { %192 = vmatpush1.bf16.msra.mxu0 %v2824_v8  ;;  %2807 = vmatpush1.bf16.msra.mxu1 %v2824_v8  ;;  %v65_v50 = vpack.c.bf16 %v39_v49, %v38_v48  ;;  %v66_v53 = vpack.c.bf16 %v41_v52, %v40_v51  ;;  %v42_v54 = vld [vmem:[%s3871_s0 + $0x70] sm:$0xff]  ;;  %v43_v55 = vld [vmem:[%s3871_s0 + $0x78] sm:$0xff]  ;;  %v44_v57 = vld [vmem:[%s3871_s0 + $0x80] sm:$0xff] }
  0x10   :  { %2634 = vmatprep.subr.bf16.mxu1 %v2825_v15  ;;  %v67_v56 = vpack.c.bf16 %v43_v55, %v42_v54  ;;  %v45_v58 = vld [vmem:[%s3871_s0 + $0x88] sm:$0xff]  ;;  %v46_v60 = vld [vmem:[%s3871_s0 + $0x90] sm:$0xff]  ;;  %v47_v61 = vld [vmem:[%s3871_s0 + $0x98] sm:$0xff] }
  0x11   :  { %v68_v59 = vpack.c.bf16 %v45_v58, %v44_v57  ;;  %v69_v62 = vpack.c.bf16 %v47_v61, %v46_v60  ;;  %v48_v63 = vld [vmem:[%s3871_s0 + $0xa0] sm:$0xff]  ;;  %v49_v0 = vld [vmem:[%s3871_s0 + $0xa8] sm:$0xff]  ;;  %v50_v3 = vld [vmem:[%s3871_s0 + $0xb0] sm:$0xff] }
  0x12   :  { %2502 = vmatmul.mubr.msk.bf16.vlgmr.msra.gmra.mrb[0].mxu0 %vm136_vm0, %v60_v13  ;;  %2514 = vmatmul.mubr.msk.bf16.vlgmr.msra.gmra.mrb[0].mxu1 %vm136_vm0, %v72_v14  ;;  %v70_v1 = vpack.c.bf16 %v49_v0, %v48_v63  ;;  %v51_v4 = vld [vmem:[%s3871_s0 + $0xb8] sm:$0xff]  ;;  %v2837_v6 = vld [vmem:[%s3874_s3 + $0x70] sm:$0xff]   ;;  %v84_v12 = vld [vmem:[%s3873_s2] sm:$0x3]  ;;  %v92_v13 = vsub.s32 1, %v3241_v10 }
  0x13   :  { %227 = vmatprep.mubr.bf16.mxu0 %v2995_v2  ;;  %347 = vmatprep.mubr.bf16.mxu1 %v2995_v2  ;;  %v71_v5 = vpack.c.bf16 %v51_v4, %v50_v3  ;;  %v2838_v7 = vld [vmem:[%s3874_s3 + $0x30] sm:$0xff]   ;;  %v2840_v8 = vld [vmem:[%s3874_s3 + $0x38] sm:$0xff]   ;;  %v3248_v14 = vrot.slane %v84_v12, %v88_v11  ;;  %v2841_v31 = vld [vmem:[%s3876_s5] sm:$0xff]  }
  0x14   :  { %2635 = vmatpush3.bf16.msra.mxu1 %v2826_v19  ;;  %v3250_v15 = vrot.slane %v84_v12, %v92_v13  ;;  %2764 = vmatprep.subr.bf16.mxu0 %v2841_v31 }
  0x15   :  { %2636 = vmatprep.subr.bf16.mxu1 %v2827_v20  ;;  %2765 = vmatpush3.bf16.msra.mxu0 %v2841_v31 }
  0x18   :  { %2637 = vmatpush3.bf16.msra.mxu1 %v2828_v22 }
  0x19   :  { %2638 = vmatprep.subr.bf16.mxu1 %v2829_v25 }
  0x1a   :  { %2503 = vmatmul.mubr.msk.bf16.gmra.mrb[4].mxu0 %vm136_vm0, %v61_v23  ;;  %2515 = vmatmul.mubr.msk.bf16.gmra.mrb[4].mxu1 %vm136_vm0, %v73_v24 }
  0x1b   :  { %237 = vmatprep.mubr.bf16.mxu0 %v2995_v2  ;;  %357 = vmatprep.mubr.bf16.mxu1 %v2995_v2 }
  0x1c   :  { %2639 = vmatpush3.bf16.msra.mxu1 %v2830_v29 }
  0x1d   :  { %2640 = vmatprep.subr.bf16.mxu1 %v2831_v30 }
  0x20   :  { %2641 = vmatpush3.bf16.msra.mxu1 %v2832_v32 }
  0x21   :  { %2642 = vmatprep.subr.bf16.mxu1 %v2833_v35 }
  0x22   :  { %2504 = vmatmul.mubr.msk.bf16.gmra.mrb[8].mxu0 %vm136_vm0, %v62_v33  ;;  %2516 = vmatmul.mubr.msk.bf16.gmra.mrb[8].mxu1 %vm136_vm0, %v74_v34 }
  0x23   :  { %247 = vmatprep.mubr.bf16.mxu0 %v2995_v2  ;;  %367 = vmatprep.mubr.bf16.mxu1 %v2995_v2 }
  0x24   :  { %2643 = vmatpush3.bf16.msra.mxu1 %v2834_v36 }
  0x25   :  { %2644 = vmatprep.subr.bf16.mxu1 %v2835_v38 }
  0x28   :  { %2645 = vmatpush3.bf16.msra.mxu1 %v2836_v42 }
  0x29   :  { %2646 = vmatprep.subr.bf16.mxu1 %v2837_v6 }
  0x2a   :  { %2505 = vmatmul.mubr.msk.bf16.gmra.mrb[12].mxu0 %vm136_vm0, %v63_v43  ;;  %2517 = vmatmul.mubr.msk.bf16.gmra.mrb[12].mxu1 %vm136_vm0, %v75_v44 }
  0x2b   :  { %257 = vmatprep.mubr.bf16.mxu0 %v2995_v2 }
  0x2c   :  { %2647 = vmatpush3.bf16.msra.mxu1 %v2838_v7 }
  0x32   :  { %2506 = vmatmul.mubr.msk.bf16.gmra.mrb[16].mxu0 %vm136_vm0, %v64_v47 }
  0x33   :  { %267 = vmatprep.mubr.bf16.mxu0 %v2995_v2 }
  0x3a   :  { %2507 = vmatmul.mubr.msk.bf16.gmra.mrb[20].mxu0 %vm136_vm0, %v65_v50 }
  0x3b   :  { %277 = vmatprep.mubr.bf16.mxu0 %v2995_v2 }
  0x42   :  { %2508 = vmatmul.mubr.msk.bf16.gmra.mrb[24].mxu0 %vm136_vm0, %v66_v53 }
  0x43   :  { %287 = vmatprep.mubr.bf16.mxu0 %v2995_v2 }
  0x4a   :  { %2509 = vmatmul.mubr.msk.bf16.gmra.mrb[28].mxu0 %vm136_vm0, %v67_v56 }
  0x4b   :  { %297 = vmatprep.mubr.bf16.mxu0 %v2995_v2 }
  0x52   :  { %2510 = vmatmul.mubr.msk.bf16.gmra.mrb[32].mxu0 %vm136_vm0, %v68_v59 }
  0x53   :  { %307 = vmatprep.mubr.bf16.mxu0 %v2995_v2 }
  0x5a   :  { %2511 = vmatmul.mubr.msk.bf16.gmra.mrb[36].mxu0 %vm136_vm0, %v69_v62 }
  0x5b   :  { %317 = vmatprep.mubr.bf16.mxu0 %v2995_v2 }
  0x62   :  { %2512 = vmatmul.mubr.msk.bf16.gmra.mrb[40].mxu0 %vm136_vm0, %v70_v1 }
  0x63   :  { %327 = vmatprep.mubr.bf16.mxu0 %v2995_v2  ;;  %v2839_v2 = vld [vmem:[%s3874_s3 + $0x78] sm:$0xff]  }
  0x64   :  { %2648 = vmatprep.subr.bf16.mxu1 %v2839_v2 }
  0x65   :  { %2649 = vmatpush3.bf16.msra.mxu1 %v2840_v8 }
  0x6a   :  { %2513 = vmatmul.mubr.msk.bf16.gmra.mrb[44].mxu0 %vm136_vm0, %v71_v5 }
  0xe5   :  { %v219_v16 = vpop.f32.mrb[0].mxu0  ;;  %v339_v17 = vpop.f32.mrb[0].mxu1 }
  0xe6   :  { %v220_v18 = vadd.f32 %v219_v16, %v3248_v14  ;;  %v221_v19 = vpop.f32.mrb[1].mxu0  ;;  %v340_v20 = vadd.f32 %v339_v17, %v3248_v14  ;;  %v341_v21 = vpop.f32.mrb[1].mxu1 }
  0xe7   :  { %v222_v22 = vadd.f32 %v221_v19, %v3250_v15  ;;  %v223_v23 = vpop.f32.mrb[2].mxu0  ;;  %v342_v24 = vadd.f32 %v341_v21, %v3250_v15  ;;  %v343_v25 = vpop.f32.mrb[2].mxu1 }
  0xe8   :  { %v224_v26 = vadd.f32 %v223_v23, %v3248_v14  ;;  %v225_v27 = vpop.f32.mrb[3].mxu0  ;;  %v426_v28 = vmax.f32 %v340_v20, 0.0  ;;  %v344_v29 = vadd.f32 %v343_v25, %v3248_v14  ;;  %v345_v30 = vpop.f32.mrb[3].mxu1  ;;  %v378_v35 = vmax.f32 %v220_v18, 0.0 }
  0xe9   :  { %v226_v32 = vadd.f32 %v225_v27, %v3250_v15  ;;  %v427_v33 = vmax.f32 %v342_v24, 0.0  ;;  %v346_v34 = vadd.f32 %v345_v30, %v3250_v15  ;;  %v379_v38 = vmax.f32 %v222_v22, 0.0 }
  0xea   :  { %v380_v36 = vmax.f32 %v224_v26, 0.0  ;;  %v428_v37 = vmax.f32 %v344_v29, 0.0 }
  0xeb   :  { %v381_v39 = vmax.f32 %v226_v32, 0.0  ;;  %v429_v40 = vmax.f32 %v346_v34, 0.0 }
  0xec   :  { %v442_v41 = vpack.c.bf16 %v380_v36, %v378_v35  ;;  %v3263_v42 = vpack.c.bf16 %v428_v37, %v426_v28 }
  0xed   :  { %v443_v43 = vpack.c.bf16 %v381_v39, %v379_v38  ;;  %v229_v44 = vpop.f32.mrb[4].mxu0  ;;  %v3265_v45 = vpack.c.bf16 %v429_v40, %v427_v33  ;;  %v349_v46 = vpop.f32.mrb[4].mxu1 }
  0xee   :  { %v230_v47 = vadd.f32 %v229_v44, %v3248_v14  ;;  %v231_v48 = vpop.f32.mrb[5].mxu0  ;;  %v350_v49 = vadd.f32 %v349_v46, %v3248_v14  ;;  %v351_v50 = vpop.f32.mrb[5].mxu1 }
  0xef   :  { %v232_v51 = vadd.f32 %v231_v48, %v3250_v15  ;;  %v233_v52 = vpop.f32.mrb[6].mxu0  ;;  %641 = vmatprep.mubr.bf16.mxu1 %v443_v43  ;;  %v352_v53 = vadd.f32 %v351_v50, %v3250_v15  ;;  %v353_v54 = vpop.f32.mrb[6].mxu1 }
  0xf0   :  { %v234_v55 = vadd.f32 %v233_v52, %v3248_v14  ;;  %v235_v56 = vpop.f32.mrb[7].mxu0  ;;  %642 = vmatmul.mubr.bf16.vlgmr.msra.gmra.mrb[16].mxu1 %v442_v41  ;;  %v430_v57 = vmax.f32 %v350_v49, 0.0  ;;  %v354_v58 = vadd.f32 %v353_v54, %v3248_v14  ;;  %v355_v59 = vpop.f32.mrb[7].mxu1  ;;  %v382_v63 = vmax.f32 %v230_v47, 0.0 }
  0xf1   :  { %v236_v60 = vadd.f32 %v235_v56, %v3250_v15  ;;  %v431_v61 = vmax.f32 %v352_v53, 0.0  ;;  %v356_v62 = vadd.f32 %v355_v59, %v3250_v15  ;;  %v383_v3 = vmax.f32 %v232_v51, 0.0 }
  0xf2   :  { %v384_v0 = vmax.f32 %v234_v55, 0.0  ;;  %v432_v1 = vmax.f32 %v354_v58, 0.0 }
  0xf3   :  { %v385_v4 = vmax.f32 %v236_v60, 0.0  ;;  %v433_v5 = vmax.f32 %v356_v62, 0.0 }
  0xf4   :  { %v444_v6 = vpack.c.bf16 %v384_v0, %v382_v63  ;;  %v3275_v7 = vpack.c.bf16 %v432_v1, %v430_v57 }
  0xf5   :  { %v445_v2 = vpack.c.bf16 %v385_v4, %v383_v3  ;;  %v239_v8 = vpop.f32.mrb[8].mxu0  ;;  %v3277_v11 = vpack.c.bf16 %v433_v5, %v431_v61  ;;  %v359_v12 = vpop.f32.mrb[8].mxu1 }
  0xf6   :  { %v240_v13 = vadd.f32 %v239_v8, %v3248_v14  ;;  %v241_v16 = vpop.f32.mrb[9].mxu0  ;;  %v360_v17 = vadd.f32 %v359_v12, %v3248_v14  ;;  %v361_v18 = vpop.f32.mrb[9].mxu1 }
  0xf7   :  { %v242_v19 = vadd.f32 %v241_v16, %v3250_v15  ;;  %v243_v20 = vpop.f32.mrb[10].mxu0  ;;  %649 = vmatprep.mubr.bf16.mxu1 %v445_v2  ;;  %v362_v21 = vadd.f32 %v361_v18, %v3250_v15  ;;  %v363_v22 = vpop.f32.mrb[10].mxu1 }
  0xf8   :  { %v244_v23 = vadd.f32 %v243_v20, %v3248_v14  ;;  %v245_v24 = vpop.f32.mrb[11].mxu0  ;;  %650 = vmatmul.mubr.bf16.gmra.mrb[20].mxu1 %v444_v6  ;;  %v434_v25 = vmax.f32 %v360_v17, 0.0  ;;  %v364_v26 = vadd.f32 %v363_v22, %v3248_v14  ;;  %v365_v27 = vpop.f32.mrb[11].mxu1  ;;  %v386_v31 = vmax.f32 %v240_v13, 0.0 }
  0xf9   :  { %v246_v28 = vadd.f32 %v245_v24, %v3250_v15  ;;  %v435_v29 = vmax.f32 %v362_v21, 0.0  ;;  %v366_v30 = vadd.f32 %v365_v27, %v3250_v15  ;;  %v387_v34 = vmax.f32 %v242_v19, 0.0 }
  0xfa   :  { %v388_v32 = vmax.f32 %v244_v23, 0.0  ;;  %v436_v33 = vmax.f32 %v364_v26, 0.0 }
  0xfb   :  { %v389_v35 = vmax.f32 %v246_v28, 0.0  ;;  %v437_v36 = vmax.f32 %v366_v30, 0.0 }
  0xfc   :  { %v446_v37 = vpack.c.bf16 %v388_v32, %v386_v31  ;;  %v3287_v38 = vpack.c.bf16 %v436_v33, %v434_v25 }
  0xfd   :  { %v447_v39 = vpack.c.bf16 %v389_v35, %v387_v34  ;;  %v249_v40 = vpop.f32.mrb[12].mxu0  ;;  %v3289_v41 = vpack.c.bf16 %v437_v36, %v435_v29  ;;  %v369_v43 = vpop.f32.mrb[12].mxu1 }
  0xfe   :  { %v250_v44 = vadd.f32 %v249_v40, %v3248_v14  ;;  %v251_v46 = vpop.f32.mrb[13].mxu0  ;;  %v370_v47 = vadd.f32 %v369_v43, %v3248_v14  ;;  %v371_v48 = vpop.f32.mrb[13].mxu1 }
  0xff   :  { %v252_v49 = vadd.f32 %v251_v46, %v3250_v15  ;;  %v253_v50 = vpop.f32.mrb[14].mxu0  ;;  %657 = vmatprep.mubr.bf16.mxu1 %v447_v39  ;;  %v372_v51 = vadd.f32 %v371_v48, %v3250_v15  ;;  %v373_v52 = vpop.f32.mrb[14].mxu1 }
 0x100   :  { %v254_v53 = vadd.f32 %v253_v50, %v3248_v14  ;;  %v255_v54 = vpop.f32.mrb[15].mxu0  ;;  %658 = vmatmul.mubr.bf16.gmra.mrb[24].mxu1 %v446_v37  ;;  %v438_v55 = vmax.f32 %v370_v47, 0.0  ;;  %v374_v56 = vadd.f32 %v373_v52, %v3248_v14  ;;  %v375_v57 = vpop.f32.mrb[15].mxu1  ;;  %v390_v61 = vmax.f32 %v250_v44, 0.0 }
 0x101   :  { %v256_v58 = vadd.f32 %v255_v54, %v3250_v15  ;;  %v439_v59 = vmax.f32 %v372_v51, 0.0  ;;  %v376_v60 = vadd.f32 %v375_v57, %v3250_v15  ;;  %v391_v0 = vmax.f32 %v252_v49, 0.0 }
 0x102   :  { %v392_v62 = vmax.f32 %v254_v53, 0.0  ;;  %v440_v63 = vmax.f32 %v374_v56, 0.0 }
 0x103   :  { %v393_v1 = vmax.f32 %v256_v58, 0.0  ;;  %v441_v3 = vmax.f32 %v376_v60, 0.0 }
 0x104   :  { %v448_v4 = vpack.c.bf16 %v392_v62, %v390_v61  ;;  %v3299_v5 = vpack.c.bf16 %v440_v63, %v438_v55 }
 0x105   :  { %v449_v6 = vpack.c.bf16 %v393_v1, %v391_v0  ;;  %v259_v2 = vpop.f32.mrb[16].mxu0  ;;  %v3301_v8 = vpack.c.bf16 %v441_v3, %v439_v59 }
 0x106   :  { %v260_v12 = vadd.f32 %v259_v2, %v3248_v14  ;;  %v261_v13 = vpop.f32.mrb[17].mxu0 }
 0x107   :  { %v262_v16 = vadd.f32 %v261_v13, %v3250_v15  ;;  %v263_v17 = vpop.f32.mrb[18].mxu0  ;;  %665 = vmatprep.mubr.bf16.mxu1 %v449_v6 }
 0x108   :  { %v264_v18 = vadd.f32 %v263_v17, %v3248_v14  ;;  %v265_v19 = vpop.f32.mrb[19].mxu0  ;;  %666 = vmatmul.mubr.bf16.gmra.mrb[28].mxu1 %v448_v4  ;;  %v394_v21 = vmax.f32 %v260_v12, 0.0 }
 0x109   :  { %v266_v20 = vadd.f32 %v265_v19, %v3250_v15  ;;  %v395_v23 = vmax.f32 %v262_v16, 0.0 }
 0x10a   :  { %v396_v22 = vmax.f32 %v264_v18, 0.0 }
 0x10b   :  { %v397_v24 = vmax.f32 %v266_v20, 0.0 }
 0x10c   :  { %v450_v25 = vpack.c.bf16 %v396_v22, %v394_v21 }
 0x10d   :  { %v451_v26 = vpack.c.bf16 %v397_v24, %v395_v23  ;;  %v269_v27 = vpop.f32.mrb[20].mxu0 }
 0x10e   :  { %v270_v28 = vadd.f32 %v269_v27, %v3248_v14  ;;  %v271_v29 = vpop.f32.mrb[21].mxu0 }
 0x10f   :  { %v272_v30 = vadd.f32 %v271_v29, %v3250_v15  ;;  %v273_v31 = vpop.f32.mrb[22].mxu0  ;;  %673 = vmatprep.mubr.bf16.mxu1 %v451_v26 }
 0x110   :  { %v274_v32 = vadd.f32 %v273_v31, %v3248_v14  ;;  %v275_v33 = vpop.f32.mrb[23].mxu0  ;;  %674 = vmatmul.mubr.bf16.gmra.mrb[32].mxu1 %v450_v25  ;;  %v398_v35 = vmax.f32 %v270_v28, 0.0 }
 0x111   :  { %v276_v34 = vadd.f32 %v275_v33, %v3250_v15  ;;  %v399_v37 = vmax.f32 %v272_v30, 0.0 }
 0x112   :  { %v400_v36 = vmax.f32 %v274_v32, 0.0 }
 0x113   :  { %v401_v39 = vmax.f32 %v276_v34, 0.0 }
 0x114   :  { %v452_v40 = vpack.c.bf16 %v400_v36, %v398_v35 }
 0x115   :  { %v453_v43 = vpack.c.bf16 %v401_v39, %v399_v37  ;;  %v279_v44 = vpop.f32.mrb[24].mxu0 }
 0x116   :  { %v280_v46 = vadd.f32 %v279_v44, %v3248_v14  ;;  %v281_v47 = vpop.f32.mrb[25].mxu0 }
 0x117   :  { %v282_v48 = vadd.f32 %v281_v47, %v3250_v15  ;;  %v283_v49 = vpop.f32.mrb[26].mxu0  ;;  %681 = vmatprep.mubr.bf16.mxu1 %v453_v43 }
 0x118   :  { %v284_v50 = vadd.f32 %v283_v49, %v3248_v14  ;;  %v285_v51 = vpop.f32.mrb[27].mxu0  ;;  %682 = vmatmul.mubr.bf16.gmra.mrb[36].mxu1 %v452_v40  ;;  %v402_v53 = vmax.f32 %v280_v46, 0.0 }
 0x119   :  { %v286_v52 = vadd.f32 %v285_v51, %v3250_v15  ;;  %v403_v55 = vmax.f32 %v282_v48, 0.0 }
 0x11a   :  { %v404_v54 = vmax.f32 %v284_v50, 0.0 }
 0x11b   :  { %v405_v56 = vmax.f32 %v286_v52, 0.0 }
 0x11c   :  { %v454_v57 = vpack.c.bf16 %v404_v54, %v402_v53 }
 0x11d   :  { %v455_v58 = vpack.c.bf16 %v405_v56, %v403_v55  ;;  %v289_v59 = vpop.f32.mrb[28].mxu0 }
 0x11e   :  { %v290_v60 = vadd.f32 %v289_v59, %v3248_v14  ;;  %v291_v61 = vpop.f32.mrb[29].mxu0 }
 0x11f   :  { %v292_v62 = vadd.f32 %v291_v61, %v3250_v15  ;;  %v293_v63 = vpop.f32.mrb[30].mxu0  ;;  %689 = vmatprep.mubr.bf16.mxu1 %v455_v58 }
 0x120   :  { %v294_v0 = vadd.f32 %v293_v63, %v3248_v14  ;;  %v295_v1 = vpop.f32.mrb[31].mxu0  ;;  %690 = vmatmul.mubr.bf16.gmra.mrb[40].mxu1 %v454_v57  ;;  %v406_v4 = vmax.f32 %v290_v60, 0.0 }
 0x121   :  { %v296_v3 = vadd.f32 %v295_v1, %v3250_v15  ;;  %v407_v2 = vmax.f32 %v292_v62, 0.0 }
 0x122   :  { %v408_v6 = vmax.f32 %v294_v0, 0.0 }
 0x123   :  { %v409_v12 = vmax.f32 %v296_v3, 0.0 }
 0x124   :  { %v456_v13 = vpack.c.bf16 %v408_v6, %v406_v4 }
 0x125   :  { %v457_v16 = vpack.c.bf16 %v409_v12, %v407_v2  ;;  %v299_v17 = vpop.f32.mrb[32].mxu0 }
 0x126   :  { %v300_v18 = vadd.f32 %v299_v17, %v3248_v14  ;;  %v301_v19 = vpop.f32.mrb[33].mxu0 }
 0x127   :  { %v302_v20 = vadd.f32 %v301_v19, %v3250_v15  ;;  %v303_v21 = vpop.f32.mrb[34].mxu0  ;;  %697 = vmatprep.mubr.bf16.mxu1 %v457_v16 }
 0x128   :  { %v304_v22 = vadd.f32 %v303_v21, %v3248_v14  ;;  %v305_v23 = vpop.f32.mrb[35].mxu0  ;;  %698 = vmatmul.mubr.bf16.gmra.mrb[44].mxu1 %v456_v13  ;;  %v410_v25 = vmax.f32 %v300_v18, 0.0 }
 0x129   :  { %v306_v24 = vadd.f32 %v305_v23, %v3250_v15  ;;  %v411_v27 = vmax.f32 %v302_v20, 0.0 }
 0x12a   :  { %v412_v26 = vmax.f32 %v304_v22, 0.0 }
 0x12b   :  { %v413_v28 = vmax.f32 %v306_v24, 0.0 }
 0x12c   :  { %v458_v29 = vpack.c.bf16 %v412_v26, %v410_v25 }
 0x12d   :  { %v459_v30 = vpack.c.bf16 %v413_v28, %v411_v27  ;;  %v309_v31 = vpop.f32.mrb[36].mxu0 }
 0x12e   :  { %v310_v32 = vadd.f32 %v309_v31, %v3248_v14  ;;  %v311_v33 = vpop.f32.mrb[37].mxu0 }
 0x12f   :  { %v312_v34 = vadd.f32 %v311_v33, %v3250_v15  ;;  %v313_v35 = vpop.f32.mrb[38].mxu0  ;;  %705 = vmatprep.mubr.bf16.mxu1 %v459_v30 }
 0x130   :  { %v314_v36 = vadd.f32 %v313_v35, %v3248_v14  ;;  %v315_v37 = vpop.f32.mrb[39].mxu0  ;;  %706 = vmatmul.mubr.bf16.gmra.mrb[48].mxu1 %v458_v29  ;;  %v414_v40 = vmax.f32 %v310_v32, 0.0 }
 0x131   :  { %v316_v39 = vadd.f32 %v315_v37, %v3250_v15  ;;  %v415_v44 = vmax.f32 %v312_v34, 0.0 }
 0x132   :  { %v416_v43 = vmax.f32 %v314_v36, 0.0 }
 0x133   :  { %v417_v46 = vmax.f32 %v316_v39, 0.0 }
 0x134   :  { %v460_v47 = vpack.c.bf16 %v416_v43, %v414_v40 }
 0x135   :  { %v461_v48 = vpack.c.bf16 %v417_v46, %v415_v44  ;;  %v319_v49 = vpop.f32.mrb[40].mxu0 }
 0x136   :  { %v320_v50 = vadd.f32 %v319_v49, %v3248_v14  ;;  %v321_v51 = vpop.f32.mrb[41].mxu0 }
 0x137   :  { %v322_v52 = vadd.f32 %v321_v51, %v3250_v15  ;;  %v323_v53 = vpop.f32.mrb[42].mxu0  ;;  %713 = vmatprep.mubr.bf16.mxu1 %v461_v48 }
 0x138   :  { %v324_v54 = vadd.f32 %v323_v53, %v3248_v14  ;;  %v325_v55 = vpop.f32.mrb[43].mxu0  ;;  %714 = vmatmul.mubr.bf16.gmra.mrb[52].mxu1 %v460_v47  ;;  %v418_v57 = vmax.f32 %v320_v50, 0.0 }
 0x139   :  { %v326_v56 = vadd.f32 %v325_v55, %v3250_v15  ;;  %v419_v59 = vmax.f32 %v322_v52, 0.0 }
 0x13a   :  { %v420_v58 = vmax.f32 %v324_v54, 0.0 }
 0x13b   :  { %v421_v60 = vmax.f32 %v326_v56, 0.0 }
 0x13c   :  { %v462_v61 = vpack.c.bf16 %v420_v58, %v418_v57 }
 0x13d   :  { %v463_v62 = vpack.c.bf16 %v421_v60, %v419_v59  ;;  %v329_v63 = vpop.f32.mrb[44].mxu0 }
 0x13e   :  { %v330_v0 = vadd.f32 %v329_v63, %v3248_v14  ;;  %v331_v1 = vpop.f32.mrb[45].mxu0 }
 0x13f   :  { %v332_v3 = vadd.f32 %v331_v1, %v3250_v15  ;;  %v333_v4 = vpop.f32.mrb[46].mxu0  ;;  %721 = vmatprep.mubr.bf16.mxu1 %v463_v62 }
 0x140   :  { %v334_v6 = vadd.f32 %v333_v4, %v3248_v14  ;;  %v335_v2 = vpop.f32.mrb[47].mxu0  ;;  %722 = vmatmul.mubr.bf16.gmra.mrb[56].mxu1 %v462_v61  ;;  %v422_v13 = vmax.f32 %v330_v0, 0.0  ;;  %v2842_v14 = vld [vmem:[%s3876_s5 + $0x8] sm:$0xff]  }
 0x141   :  { %v336_v12 = vadd.f32 %v335_v2, %v3250_v15  ;;  %v423_v17 = vmax.f32 %v332_v3, 0.0  ;;  %2766 = vmatprep.subr.bf16.mxu0 %v2842_v14 }
 0x142   :  { %v424_v16 = vmax.f32 %v334_v6, 0.0  ;;  %2767 = vmatpush3.bf16.msra.mxu0 %v2842_v14 }
 0x143   :  { %v425_v18 = vmax.f32 %v336_v12, 0.0 }
 0x144   :  { %v464_v19 = vpack.c.bf16 %v424_v16, %v422_v13 }
 0x145   :  { %v465_v20 = vpack.c.bf16 %v425_v18, %v423_v17 }
 0x147   :  { %729 = vmatprep.mubr.bf16.mxu1 %v465_v20 }
 0x148   :  { %730 = vmatmul.mubr.bf16.gmra.mrb[60].mxu1 %v464_v19 }
 0x149   :  { %737 = vmatprep.mubr.bf16.mxu1 %v3265_v45 }
 0x150   :  { %738 = vmatmul.mubr.bf16.gmra.mrb[64].mxu1 %v3263_v42  ;;  %v3349_v42 = vld [vmem:[%s3875_s4] ss:$0 sm:$0xff] }
 0x151   :  { %745 = vmatprep.mubr.bf16.mxu1 %v3277_v11 }
 0x158   :  { %746 = vmatmul.mubr.bf16.gmra.mrb[68].mxu1 %v3275_v7 }
 0x159   :  { %753 = vmatprep.mubr.bf16.mxu1 %v3289_v41 }
 0x160   :  { %754 = vmatmul.mubr.bf16.gmra.mrb[72].mxu1 %v3287_v38 }
 0x161   :  { %761 = vmatprep.mubr.bf16.mxu1 %v3301_v8 }
 0x168   :  { %762 = vmatmul.mubr.bf16.gmra.mrb[76].mxu1 %v3299_v5 }
 0x1c3   :  { %v2650_v15 = vpop.f32.mrb[16].mxu1 }
 0x1c4   :  { %v2651_v45 = vpop.f32.mrb[17].mxu1 }
 0x1c5   :  { %v2652_v11 = vadd.f32 %v2651_v45, %v2650_v15  ;;  %v2653_v21 = vpop.f32.mrb[18].mxu1 }
 0x1c6   :  { %v2654_v22 = vpop.f32.mrb[19].mxu1 }
 0x1c7   :  { %v644_v7 = vadd.f32 %v2652_v11, %v3349_v42  ;;  %v2655_v23 = vadd.f32 %v2654_v22, %v2653_v21 }
 0x1c9   :  { %v647_v41 = vadd.f32 %v2655_v23, %v3349_v42  ;;  %v770_v38 = vmax.f32 %v644_v7, 0.0 }
 0x1cb   :  { %v771_v24 = vmax.f32 %v647_v41, 0.0  ;;  %v2656_v8 = vpop.f32.mrb[20].mxu1 }
 0x1cc   :  { %v2657_v25 = vpop.f32.mrb[21].mxu1 }
 0x1cd   :  { %v802_v5 = vpack.c.bf16 %v771_v24, %v770_v38  ;;  %v2658_v26 = vadd.f32 %v2657_v25, %v2656_v8  ;;  %v2659_v27 = vpop.f32.mrb[22].mxu1 }
 0x1ce   :  { %v2660_v28 = vpop.f32.mrb[23].mxu1 }
 0x1cf   :  { %v652_v29 = vadd.f32 %v2658_v26, %v3349_v42  ;;  %v2661_v30 = vadd.f32 %v2660_v28, %v2659_v27  ;;  %2768 = vmatprep.mubr.msk.bf16.mxu0 %vm841_vm1, %v802_v5 }
 0x1d1   :  { %v655_v31 = vadd.f32 %v2661_v30, %v3349_v42  ;;  %v772_v32 = vmax.f32 %v652_v29, 0.0 }
 0x1d3   :  { %v773_v33 = vmax.f32 %v655_v31, 0.0  ;;  %v2662_v34 = vpop.f32.mrb[24].mxu1 }
 0x1d4   :  { %v2663_v35 = vpop.f32.mrb[25].mxu1 }
 0x1d5   :  { %v803_v36 = vpack.c.bf16 %v773_v33, %v772_v32  ;;  %v2664_v37 = vadd.f32 %v2663_v35, %v2662_v34  ;;  %v2665_v39 = vpop.f32.mrb[26].mxu1 }
 0x1d6   :  { %v2666_v40 = vpop.f32.mrb[27].mxu1 }
 0x1d7   :  { %v660_v43 = vadd.f32 %v2664_v37, %v3349_v42  ;;  %v2667_v44 = vadd.f32 %v2666_v40, %v2665_v39  ;;  %2769 = vmatmul.mubr.msk.bf16.vlgmr.msra.gmra.mrb[48].mxu0 %vm841_vm1, %v803_v36 }
 0x1d9   :  { %v663_v46 = vadd.f32 %v2667_v44, %v3349_v42  ;;  %v774_v47 = vmax.f32 %v660_v43, 0.0 }
 0x1db   :  { %v775_v48 = vmax.f32 %v663_v46, 0.0  ;;  %v2668_v49 = vpop.f32.mrb[28].mxu1 }
 0x1dc   :  { %v2669_v50 = vpop.f32.mrb[29].mxu1 }
 0x1dd   :  { %v804_v51 = vpack.c.bf16 %v775_v48, %v774_v47  ;;  %v2670_v52 = vadd.f32 %v2669_v50, %v2668_v49  ;;  %v2671_v53 = vpop.f32.mrb[30].mxu1 }
 0x1de   :  { %v2672_v54 = vpop.f32.mrb[31].mxu1 }
 0x1df   :  { %v668_v55 = vadd.f32 %v2670_v52, %v3349_v42  ;;  %v2673_v56 = vadd.f32 %v2672_v54, %v2671_v53  ;;  %2772 = vmatprep.mubr.msk.bf16.mxu0 %vm841_vm1, %v804_v51 }
 0x1e1   :  { %v671_v57 = vadd.f32 %v2673_v56, %v3349_v42  ;;  %v776_v58 = vmax.f32 %v668_v55, 0.0 }
 0x1e3   :  { %v777_v59 = vmax.f32 %v671_v57, 0.0  ;;  %v2674_v60 = vpop.f32.mrb[32].mxu1 }
 0x1e4   :  { %v2675_v61 = vpop.f32.mrb[33].mxu1 }
 0x1e5   :  { %v805_v62 = vpack.c.bf16 %v777_v59, %v776_v58  ;;  %v2676_v63 = vadd.f32 %v2675_v61, %v2674_v60  ;;  %v2677_v0 = vpop.f32.mrb[34].mxu1 }
 0x1e6   :  { %v2678_v1 = vpop.f32.mrb[35].mxu1 }
 0x1e7   :  { %v676_v3 = vadd.f32 %v2676_v63, %v3349_v42  ;;  %v2679_v4 = vadd.f32 %v2678_v1, %v2677_v0  ;;  %2773 = vmatmul.mubr.msk.bf16.gmra.mrb[52].mxu0 %vm841_vm1, %v805_v62 }
 0x1e9   :  { %v679_v6 = vadd.f32 %v2679_v4, %v3349_v42  ;;  %v778_v2 = vmax.f32 %v676_v3, 0.0 }
 0x1eb   :  { %v779_v12 = vmax.f32 %v679_v6, 0.0  ;;  %v2680_v13 = vpop.f32.mrb[36].mxu1 }
 0x1ec   :  { %v2681_v16 = vpop.f32.mrb[37].mxu1 }
 0x1ed   :  { %v806_v17 = vpack.c.bf16 %v779_v12, %v778_v2  ;;  %v2682_v18 = vadd.f32 %v2681_v16, %v2680_v13  ;;  %v2683_v19 = vpop.f32.mrb[38].mxu1 }
 0x1ee   :  { %v2684_v20 = vpop.f32.mrb[39].mxu1 }
 0x1ef   :  { %v684_v14 = vadd.f32 %v2682_v18, %v3349_v42  ;;  %v2685_v15 = vadd.f32 %v2684_v20, %v2683_v19  ;;  %2776 = vmatprep.mubr.msk.bf16.mxu0 %vm841_vm1, %v806_v17 }
 0x1f1   :  { %v687_v45 = vadd.f32 %v2685_v15, %v3349_v42  ;;  %v780_v11 = vmax.f32 %v684_v14, 0.0 }
 0x1f3   :  { %v781_v21 = vmax.f32 %v687_v45, 0.0  ;;  %v2686_v22 = vpop.f32.mrb[40].mxu1 }
 0x1f4   :  { %v2687_v7 = vpop.f32.mrb[41].mxu1 }
 0x1f5   :  { %v807_v23 = vpack.c.bf16 %v781_v21, %v780_v11  ;;  %v2688_v41 = vadd.f32 %v2687_v7, %v2686_v22  ;;  %v2689_v38 = vpop.f32.mrb[42].mxu1 }
 0x1f6   :  { %v2690_v24 = vpop.f32.mrb[43].mxu1 }
 0x1f7   :  { %v692_v8 = vadd.f32 %v2688_v41, %v3349_v42  ;;  %v2691_v25 = vadd.f32 %v2690_v24, %v2689_v38  ;;  %2777 = vmatmul.mubr.msk.bf16.gmra.mrb[56].mxu0 %vm841_vm1, %v807_v23 }
 0x1f9   :  { %v695_v5 = vadd.f32 %v2691_v25, %v3349_v42  ;;  %v782_v26 = vmax.f32 %v692_v8, 0.0 }
 0x1fb   :  { %v783_v27 = vmax.f32 %v695_v5, 0.0  ;;  %v2692_v28 = vpop.f32.mrb[44].mxu1 }
 0x1fc   :  { %v2693_v29 = vpop.f32.mrb[45].mxu1 }
 0x1fd   :  { %v808_v30 = vpack.c.bf16 %v783_v27, %v782_v26  ;;  %v2694_v31 = vadd.f32 %v2693_v29, %v2692_v28  ;;  %v2695_v32 = vpop.f32.mrb[46].mxu1 }
 0x1fe   :  { %v2696_v33 = vpop.f32.mrb[47].mxu1 }
 0x1ff   :  { %v700_v34 = vadd.f32 %v2694_v31, %v3349_v42  ;;  %v2697_v35 = vadd.f32 %v2696_v33, %v2695_v32  ;;  %2780 = vmatprep.mubr.msk.bf16.mxu0 %vm841_vm1, %v808_v30 }
 0x201   :  { %v703_v36 = vadd.f32 %v2697_v35, %v3349_v42  ;;  %v784_v37 = vmax.f32 %v700_v34, 0.0 }
 0x203   :  { %v785_v39 = vmax.f32 %v703_v36, 0.0  ;;  %v2698_v40 = vpop.f32.mrb[48].mxu1 }
 0x204   :  { %v2699_v43 = vpop.f32.mrb[49].mxu1 }
 0x205   :  { %v809_v44 = vpack.c.bf16 %v785_v39, %v784_v37  ;;  %v2700_v46 = vadd.f32 %v2699_v43, %v2698_v40  ;;  %v2701_v47 = vpop.f32.mrb[50].mxu1 }
 0x206   :  { %v2702_v48 = vpop.f32.mrb[51].mxu1 }
 0x207   :  { %v708_v49 = vadd.f32 %v2700_v46, %v3349_v42  ;;  %v2703_v50 = vadd.f32 %v2702_v48, %v2701_v47  ;;  %2781 = vmatmul.mubr.msk.bf16.gmra.mrb[60].mxu0 %vm841_vm1, %v809_v44 }
 0x209   :  { %v711_v51 = vadd.f32 %v2703_v50, %v3349_v42  ;;  %v786_v52 = vmax.f32 %v708_v49, 0.0 }
 0x20b   :  { %v787_v53 = vmax.f32 %v711_v51, 0.0  ;;  %v2704_v54 = vpop.f32.mrb[52].mxu1 }
 0x20c   :  { %v2705_v55 = vpop.f32.mrb[53].mxu1 }
 0x20d   :  { %v810_v56 = vpack.c.bf16 %v787_v53, %v786_v52  ;;  %v2706_v57 = vadd.f32 %v2705_v55, %v2704_v54  ;;  %v2707_v58 = vpop.f32.mrb[54].mxu1 }
 0x20e   :  { %v2708_v59 = vpop.f32.mrb[55].mxu1 }
 0x20f   :  { %v716_v60 = vadd.f32 %v2706_v57, %v3349_v42  ;;  %v2709_v61 = vadd.f32 %v2708_v59, %v2707_v58  ;;  %2784 = vmatprep.mubr.msk.bf16.mxu0 %vm841_vm1, %v810_v56 }
 0x211   :  { %v719_v62 = vadd.f32 %v2709_v61, %v3349_v42  ;;  %v788_v63 = vmax.f32 %v716_v60, 0.0 }
 0x213   :  { %v789_v0 = vmax.f32 %v719_v62, 0.0  ;;  %v2710_v1 = vpop.f32.mrb[56].mxu1 }
 0x214   :  { %v2711_v3 = vpop.f32.mrb[57].mxu1 }
 0x215   :  { %v811_v4 = vpack.c.bf16 %v789_v0, %v788_v63  ;;  %v2712_v6 = vadd.f32 %v2711_v3, %v2710_v1  ;;  %v2713_v2 = vpop.f32.mrb[58].mxu1 }
 0x216   :  { %v2714_v12 = vpop.f32.mrb[59].mxu1 }
 0x217   :  { %v724_v13 = vadd.f32 %v2712_v6, %v3349_v42  ;;  %v2715_v16 = vadd.f32 %v2714_v12, %v2713_v2  ;;  %2785 = vmatmul.mubr.msk.bf16.gmra.mrb[64].mxu0 %vm841_vm1, %v811_v4 }
 0x219   :  { %v727_v17 = vadd.f32 %v2715_v16, %v3349_v42  ;;  %v790_v18 = vmax.f32 %v724_v13, 0.0  ;;  %v3402_v13 = vld [vmem:[%s3877_s6] ss:$0 sm:$0xff]  ;;  %v3405_v16 = vand.u32 127, %v86_v9 }
 0x21b   :  { %v791_v19 = vmax.f32 %v727_v17, 0.0  ;;  %v2716_v20 = vpop.f32.mrb[60].mxu1  ;;  %vm1085_vm2 = vcmp.lt.s32.totalorder %v3405_v16, 10 }
 0x21c   :  { %v2717_v14 = vpop.f32.mrb[61].mxu1 }
 0x21d   :  { %v812_v15 = vpack.c.bf16 %v791_v19, %v790_v18  ;;  %v2718_v45 = vadd.f32 %v2717_v14, %v2716_v20  ;;  %v2719_v11 = vpop.f32.mrb[62].mxu1 }
 0x21e   :  { %v2720_v21 = vpop.f32.mrb[63].mxu1 }
 0x21f   :  { %v732_v22 = vadd.f32 %v2718_v45, %v3349_v42  ;;  %v2721_v7 = vadd.f32 %v2720_v21, %v2719_v11  ;;  %2788 = vmatprep.mubr.msk.bf16.mxu0 %vm841_vm1, %v812_v15 }
 0x221   :  { %v735_v23 = vadd.f32 %v2721_v7, %v3349_v42  ;;  %v792_v41 = vmax.f32 %v732_v22, 0.0 }
 0x223   :  { %v793_v38 = vmax.f32 %v735_v23, 0.0  ;;  %v2722_v24 = vpop.f32.mrb[64].mxu1 }
 0x224   :  { %v2723_v8 = vpop.f32.mrb[65].mxu1 }
 0x225   :  { %v813_v25 = vpack.c.bf16 %v793_v38, %v792_v41  ;;  %v2724_v5 = vadd.f32 %v2723_v8, %v2722_v24  ;;  %v2725_v26 = vpop.f32.mrb[66].mxu1 }
 0x226   :  { %v2726_v27 = vpop.f32.mrb[67].mxu1 }
 0x227   :  { %v740_v28 = vadd.f32 %v2724_v5, %v3349_v42  ;;  %v2727_v29 = vadd.f32 %v2726_v27, %v2725_v26  ;;  %2789 = vmatmul.mubr.msk.bf16.gmra.mrb[68].mxu0 %vm841_vm1, %v813_v25 }
 0x229   :  { %v743_v30 = vadd.f32 %v2727_v29, %v3349_v42  ;;  %v794_v31 = vmax.f32 %v740_v28, 0.0 }
 0x22b   :  { %v795_v32 = vmax.f32 %v743_v30, 0.0  ;;  %v2728_v33 = vpop.f32.mrb[68].mxu1 }
 0x22c   :  { %v2729_v34 = vpop.f32.mrb[69].mxu1 }
 0x22d   :  { %v814_v35 = vpack.c.bf16 %v795_v32, %v794_v31  ;;  %v2730_v36 = vadd.f32 %v2729_v34, %v2728_v33  ;;  %v2731_v37 = vpop.f32.mrb[70].mxu1 }
 0x22e   :  { %v2732_v39 = vpop.f32.mrb[71].mxu1 }
 0x22f   :  { %v748_v40 = vadd.f32 %v2730_v36, %v3349_v42  ;;  %v2733_v43 = vadd.f32 %v2732_v39, %v2731_v37  ;;  %2792 = vmatprep.mubr.msk.bf16.mxu0 %vm841_vm1, %v814_v35 }
 0x231   :  { %v751_v44 = vadd.f32 %v2733_v43, %v3349_v42  ;;  %v796_v46 = vmax.f32 %v748_v40, 0.0 }
 0x233   :  { %v797_v47 = vmax.f32 %v751_v44, 0.0  ;;  %v2734_v48 = vpop.f32.mrb[72].mxu1 }
 0x234   :  { %v2735_v49 = vpop.f32.mrb[73].mxu1 }
 0x235   :  { %v815_v50 = vpack.c.bf16 %v797_v47, %v796_v46  ;;  %v2736_v51 = vadd.f32 %v2735_v49, %v2734_v48  ;;  %v2737_v52 = vpop.f32.mrb[74].mxu1 }
 0x236   :  { %v2738_v53 = vpop.f32.mrb[75].mxu1 }
 0x237   :  { %v756_v54 = vadd.f32 %v2736_v51, %v3349_v42  ;;  %v2739_v55 = vadd.f32 %v2738_v53, %v2737_v52  ;;  %2793 = vmatmul.mubr.msk.bf16.gmra.mrb[72].mxu0 %vm841_vm1, %v815_v50 }
 0x239   :  { %v759_v56 = vadd.f32 %v2739_v55, %v3349_v42  ;;  %v798_v57 = vmax.f32 %v756_v54, 0.0 }
 0x23b   :  { %v799_v58 = vmax.f32 %v759_v56, 0.0  ;;  %v2740_v59 = vpop.f32.mrb[76].mxu1 }
 0x23c   :  { %v2741_v60 = vpop.f32.mrb[77].mxu1 }
 0x23d   :  { %v816_v61 = vpack.c.bf16 %v799_v58, %v798_v57  ;;  %v2742_v62 = vadd.f32 %v2741_v60, %v2740_v59  ;;  %v2743_v63 = vpop.f32.mrb[78].mxu1 }
 0x23e   :  { %v2744_v0 = vpop.f32.mrb[79].mxu1 }
 0x23f   :  { %v764_v1 = vadd.f32 %v2742_v62, %v3349_v42  ;;  %v2745_v3 = vadd.f32 %v2744_v0, %v2743_v63  ;;  %2796 = vmatprep.mubr.msk.bf16.mxu0 %vm841_vm1, %v816_v61 }
 0x241   :  { %v767_v4 = vadd.f32 %v2745_v3, %v3349_v42  ;;  %v800_v6 = vmax.f32 %v764_v1, 0.0 }
 0x243   :  { %v801_v2 = vmax.f32 %v767_v4, 0.0 }
 0x245   :  { %v817_v12 = vpack.c.bf16 %v801_v2, %v800_v6 }
 0x247   :  { %2797 = vmatmul.mubr.msk.bf16.gmra.mrb[76].mxu0 %vm841_vm1, %v817_v12 }
 0x2aa   :  { %v2770_v17 = vpop.f32.mrb[48].mxu0 }
 0x2ab   :  { %v933_v18 = vadd.f32 %v2770_v17, %v3402_v13  ;;  %v924_v19 = vpop.f32.mrb[49].mxu0 }
 0x2ac   :  { %v925_v20 = vadd.f32 %v3402_v13, %v924_v19  ;;  %v2771_v42 = vpop.f32.mrb[50].mxu0 }
 0x2ad   :  { %v1053_v14 = vmax.f32 %v933_v18, 0.0  ;;  %v936_v15 = vadd.f32 %v2771_v42, %v3402_v13  ;;  %v927_v45 = vpop.f32.mrb[51].mxu0 }
 0x2ae   :  { %v1051_v11 = vmax.f32 %v925_v20, 0.0  ;;  %v928_v21 = vadd.f32 %v3402_v13, %v927_v45 }
 0x2af   :  { %v1054_v22 = vmax.f32 %v936_v15, 0.0  ;;  %v3414_v9 = vsel %vm1085_vm2, %v1053_v14, -1e+30 }
 0x2b0   :  { %v1052_v7 = vmax.f32 %v928_v21, 0.0  ;;  %1122 = vmax.xlane.f32.xlu1 %v3414_v9  ;;  %v3419_v23 = vsel %vm1085_vm2, %v1051_v11, -1e+30 }
 0x2b1   :  { %1118 = vmax.xlane.f32.xlu0 %v3419_v23  ;;  %v3424_v41 = vsel %vm1085_vm2, %v1054_v22, -1e+30 }
 0x2b2   :  { %v3429_v38 = vsel %vm1085_vm2, %v1052_v7, -1e+30 }
 0x2b4   :  { %1124 = vmax.xlane.f32.xlu1 %v3424_v41 }
 0x2b5   :  { %1120 = vmax.xlane.f32.xlu0 %v3429_v38 }
 0x2ba   :  { %v2774_v24 = vpop.f32.mrb[52].mxu0 }
 0x2bb   :  { %v949_v8 = vadd.f32 %v2774_v24, %v3402_v13  ;;  %v940_v25 = vpop.f32.mrb[53].mxu0 }
 0x2bc   :  { %v941_v5 = vadd.f32 %v3402_v13, %v940_v25  ;;  %v2775_v26 = vpop.f32.mrb[54].mxu0 }
 0x2bd   :  { %v1057_v27 = vmax.f32 %v949_v8, 0.0  ;;  %v952_v28 = vadd.f32 %v2775_v26, %v3402_v13  ;;  %v943_v29 = vpop.f32.mrb[55].mxu0 }
 0x2be   :  { %v944_v30 = vadd.f32 %v3402_v13, %v943_v29  ;;  %v1055_v31 = vmax.f32 %v941_v5, 0.0 }
 0x2bf   :  { %v1058_v32 = vmax.f32 %v952_v28, 0.0  ;;  %v3438_v33 = vsel %vm1085_vm2, %v1057_v27, -1e+30 }
 0x2c0   :  { %1130 = vmax.xlane.f32.xlu0 %v3438_v33  ;;  %v1056_v34 = vmax.f32 %v944_v30, 0.0  ;;  %v3448_v36 = vsel %vm1085_vm2, %v1055_v31, -1e+30 }
 0x2c1   :  { %v3443_v35 = vsel %vm1085_vm2, %v1058_v32, -1e+30 }
 0x2c2   :  { %1132 = vmax.xlane.f32.xlu1 %v3443_v35  ;;  %v3453_v37 = vsel %vm1085_vm2, %v1056_v34, -1e+30 }
 0x2c4   :  { %1126 = vmax.xlane.f32.xlu0 %v3448_v36 }
 0x2c6   :  { %1128 = vmax.xlane.f32.xlu1 %v3453_v37 }
 0x2ca   :  { %v2778_v39 = vpop.f32.mrb[56].mxu0 }
 0x2cb   :  { %v965_v40 = vadd.f32 %v2778_v39, %v3402_v13  ;;  %v956_v43 = vpop.f32.mrb[57].mxu0 }
 0x2cc   :  { %v957_v44 = vadd.f32 %v3402_v13, %v956_v43  ;;  %v2779_v46 = vpop.f32.mrb[58].mxu0 }
 0x2cd   :  { %v1061_v47 = vmax.f32 %v965_v40, 0.0  ;;  %v968_v48 = vadd.f32 %v2779_v46, %v3402_v13  ;;  %v959_v49 = vpop.f32.mrb[59].mxu0 }
 0x2ce   :  { %v960_v50 = vadd.f32 %v3402_v13, %v959_v49  ;;  %v1059_v51 = vmax.f32 %v957_v44, 0.0 }
 0x2cf   :  { %v1062_v52 = vmax.f32 %v968_v48, 0.0  ;;  %v3462_v53 = vsel %vm1085_vm2, %v1061_v47, -1e+30 }
 0x2d0   :  { %1138 = vmax.xlane.f32.xlu0 %v3462_v53  ;;  %v1060_v54 = vmax.f32 %v960_v50, 0.0  ;;  %v3472_v56 = vsel %vm1085_vm2, %v1059_v51, -1e+30 }
 0x2d1   :  { %v3467_v55 = vsel %vm1085_vm2, %v1062_v52, -1e+30 }
 0x2d2   :  { %1140 = vmax.xlane.f32.xlu1 %v3467_v55  ;;  %v3477_v57 = vsel %vm1085_vm2, %v1060_v54, -1e+30 }
 0x2d4   :  { %1134 = vmax.xlane.f32.xlu0 %v3472_v56 }
 0x2d6   :  { %1136 = vmax.xlane.f32.xlu1 %v3477_v57 }
 0x2da   :  { %v2782_v58 = vpop.f32.mrb[60].mxu0 }
 0x2db   :  { %v981_v59 = vadd.f32 %v2782_v58, %v3402_v13  ;;  %v972_v60 = vpop.f32.mrb[61].mxu0 }
 0x2dc   :  { %v973_v61 = vadd.f32 %v3402_v13, %v972_v60  ;;  %v2783_v62 = vpop.f32.mrb[62].mxu0 }
 0x2dd   :  { %v1065_v63 = vmax.f32 %v981_v59, 0.0  ;;  %v984_v0 = vadd.f32 %v2783_v62, %v3402_v13  ;;  %v975_v1 = vpop.f32.mrb[63].mxu0 }
 0x2de   :  { %v976_v3 = vadd.f32 %v3402_v13, %v975_v1  ;;  %v1063_v4 = vmax.f32 %v973_v61, 0.0 }
 0x2df   :  { %v1066_v6 = vmax.f32 %v984_v0, 0.0  ;;  %v3486_v2 = vsel %vm1085_vm2, %v1065_v63, -1e+30 }
 0x2e0   :  { %1146 = vmax.xlane.f32.xlu0 %v3486_v2  ;;  %v1064_v12 = vmax.f32 %v976_v3, 0.0  ;;  %v3496_v18 = vsel %vm1085_vm2, %v1063_v4, -1e+30 }
 0x2e1   :  { %v3491_v17 = vsel %vm1085_vm2, %v1066_v6, -1e+30 }
 0x2e2   :  { %1148 = vmax.xlane.f32.xlu1 %v3491_v17  ;;  %v3501_v19 = vsel %vm1085_vm2, %v1064_v12, -1e+30 }
 0x2e4   :  { %1142 = vmax.xlane.f32.xlu0 %v3496_v18 }
 0x2e6   :  { %1144 = vmax.xlane.f32.xlu1 %v3501_v19 }
 0x2ea   :  { %v2786_v20 = vpop.f32.mrb[64].mxu0 }
 0x2eb   :  { %v997_v42 = vadd.f32 %v2786_v20, %v3402_v13  ;;  %v988_v14 = vpop.f32.mrb[65].mxu0 }
 0x2ec   :  { %v989_v15 = vadd.f32 %v3402_v13, %v988_v14  ;;  %v2787_v45 = vpop.f32.mrb[66].mxu0 }
 0x2ed   :  { %v1069_v11 = vmax.f32 %v997_v42, 0.0  ;;  %v1000_v21 = vadd.f32 %v2787_v45, %v3402_v13  ;;  %v991_v22 = vpop.f32.mrb[67].mxu0 }
 0x2ee   :  { %v992_v7 = vadd.f32 %v3402_v13, %v991_v22  ;;  %v1067_v24 = vmax.f32 %v989_v15, 0.0 }
 0x2ef   :  { %v1070_v8 = vmax.f32 %v1000_v21, 0.0  ;;  %v3510_v25 = vsel %vm1085_vm2, %v1069_v11, -1e+30 }
 0x2f0   :  { %1154 = vmax.xlane.f32.xlu0 %v3510_v25  ;;  %v1068_v5 = vmax.f32 %v992_v7, 0.0  ;;  %v3520_v27 = vsel %vm1085_vm2, %v1067_v24, -1e+30 }
 0x2f1   :  { %v3515_v26 = vsel %vm1085_vm2, %v1070_v8, -1e+30 }
 0x2f2   :  { %1156 = vmax.xlane.f32.xlu1 %v3515_v26  ;;  %v3525_v28 = vsel %vm1085_vm2, %v1068_v5, -1e+30 }
 0x2f4   :  { %1150 = vmax.xlane.f32.xlu0 %v3520_v27 }
 0x2f6   :  { %1152 = vmax.xlane.f32.xlu1 %v3525_v28 }
 0x2fa   :  { %v2790_v29 = vpop.f32.mrb[68].mxu0 }
 0x2fb   :  { %v1013_v30 = vadd.f32 %v2790_v29, %v3402_v13  ;;  %v1004_v31 = vpop.f32.mrb[69].mxu0 }
 0x2fc   :  { %v1005_v32 = vadd.f32 %v3402_v13, %v1004_v31  ;;  %v2791_v34 = vpop.f32.mrb[70].mxu0 }
 0x2fd   :  { %v1073_v39 = vmax.f32 %v1013_v30, 0.0  ;;  %v1016_v40 = vadd.f32 %v2791_v34, %v3402_v13  ;;  %v1007_v43 = vpop.f32.mrb[71].mxu0 }
 0x2fe   :  { %v1008_v44 = vadd.f32 %v3402_v13, %v1007_v43  ;;  %v1071_v46 = vmax.f32 %v1005_v32, 0.0 }
 0x2ff   :  { %v1074_v47 = vmax.f32 %v1016_v40, 0.0  ;;  %v3534_v48 = vsel %vm1085_vm2, %v1073_v39, -1e+30 }
 0x300   :  { %1162 = vmax.xlane.f32.xlu0 %v3534_v48  ;;  %v1072_v49 = vmax.f32 %v1008_v44, 0.0  ;;  %v3544_v51 = vsel %vm1085_vm2, %v1071_v46, -1e+30 }
 0x301   :  { %v3539_v50 = vsel %vm1085_vm2, %v1074_v47, -1e+30 }
 0x302   :  { %1164 = vmax.xlane.f32.xlu1 %v3539_v50  ;;  %v3549_v52 = vsel %vm1085_vm2, %v1072_v49, -1e+30 }
 0x304   :  { %1158 = vmax.xlane.f32.xlu0 %v3544_v51 }
 0x306   :  { %1160 = vmax.xlane.f32.xlu1 %v3549_v52 }
 0x30a   :  { %v2794_v54 = vpop.f32.mrb[72].mxu0 }
 0x30b   :  { %v1029_v58 = vadd.f32 %v2794_v54, %v3402_v13  ;;  %v1020_v59 = vpop.f32.mrb[73].mxu0 }
 0x30c   :  { %v1021_v60 = vadd.f32 %v3402_v13, %v1020_v59  ;;  %v2795_v61 = vpop.f32.mrb[74].mxu0 }
 0x30d   :  { %v1077_v62 = vmax.f32 %v1029_v58, 0.0  ;;  %v1032_v63 = vadd.f32 %v2795_v61, %v3402_v13  ;;  %v1023_v0 = vpop.f32.mrb[75].mxu0 }
 0x30e   :  { %v1024_v1 = vadd.f32 %v3402_v13, %v1023_v0  ;;  %v1075_v3 = vmax.f32 %v1021_v60, 0.0 }
 0x30f   :  { %v1078_v4 = vmax.f32 %v1032_v63, 0.0  ;;  %v3558_v6 = vsel %vm1085_vm2, %v1077_v62, -1e+30 }
 0x310   :  { %1170 = vmax.xlane.f32.xlu0 %v3558_v6  ;;  %v1076_v12 = vmax.f32 %v1024_v1, 0.0  ;;  %v3568_v42 = vsel %vm1085_vm2, %v1075_v3, -1e+30 }
 0x311   :  { %v3563_v20 = vsel %vm1085_vm2, %v1078_v4, -1e+30 }
 0x312   :  { %1172 = vmax.xlane.f32.xlu1 %v3563_v20  ;;  %v3573_v14 = vsel %vm1085_vm2, %v1076_v12, -1e+30 }
 0x314   :  { %1166 = vmax.xlane.f32.xlu0 %v3568_v42 }
 0x316   :  { %1168 = vmax.xlane.f32.xlu1 %v3573_v14 }
 0x31a   :  { %v2798_v15 = vpop.f32.mrb[76].mxu0 }
 0x31b   :  { %v1036_v45 = vpop.f32.mrb[77].mxu0  ;;  %v1045_v11 = vadd.f32 %v2798_v15, %v3402_v13 }
 0x31c   :  { %v1037_v21 = vadd.f32 %v3402_v13, %v1036_v45  ;;  %v2799_v22 = vpop.f32.mrb[78].mxu0 }
 0x31d   :  { %v1039_v7 = vpop.f32.mrb[79].mxu0  ;;  %v1048_v8 = vadd.f32 %v2799_v22, %v3402_v13  ;;  %v1081_v29 = vmax.f32 %v1045_v11, 0.0 }
 0x31e   :  { %v1079_v24 = vmax.f32 %v1037_v21, 0.0  ;;  %v1040_v5 = vadd.f32 %v3402_v13, %v1039_v7 }
 0x31f   :  { %v1082_v32 = vmax.f32 %v1048_v8, 0.0  ;;  %v3592_v39 = vsel %vm1085_vm2, %v1081_v29, -1e+30 }
 0x320   :  { %v1080_v30 = vmax.f32 %v1040_v5, 0.0  ;;  %v3582_v31 = vsel %vm1085_vm2, %v1079_v24, -1e+30 }
 0x321   :  { %1174 = vmax.xlane.f32.xlu0 %v3582_v31  ;;  %v3597_v13 = vsel %vm1085_vm2, %v1082_v32, -1e+30 }
 0x322   :  { %v3587_v34 = vsel %vm1085_vm2, %v1080_v30, -1e+30 }
 0x323   :  { %1176 = vmax.xlane.f32.xlu1 %v3587_v34 }
 0x325   :  { %1178 = vmax.xlane.f32.xlu0 %v3592_v39 }
 0x327   :  { %1180 = vmax.xlane.f32.xlu1 %v3597_v13 }
 0x33d   :  { %v1123_v40 = vpop.xlane.xlu1 %1122 }
 0x33e   :  { %v1184_v43 = vsub.f32 %v3414_v9, %v1123_v40  ;;  %v1119_v44 = vpop.xlane.xlu0 %1118 }
 0x33f   :  { %v1182_v46 = vsub.f32 %v3419_v23, %v1119_v44 }
 0x340   :  { %v1218_v47 = vmul.f32 1.442695, %v1184_v43 }
 0x341   :  { %v1214_v49 = vmul.f32 1.442695, %v1182_v46  ;;  %v1125_v54 = vpop.xlane.xlu1 %1124 }
 0x342   :  { %2843 = vpow2.f32 %v1218_v47  ;;  %v1185_v58 = vsub.f32 %v3424_v41, %v1125_v54  ;;  %v1121_v59 = vpop.xlane.xlu0 %1120 }
 0x343   :  { %v1183_v60 = vsub.f32 %v3429_v38, %v1121_v59  ;;  %2845 = vpow2.f32 %v1214_v49 }
 0x344   :  { %v1220_v16 = vmul.f32 1.442695, %v1185_v58 }
 0x345   :  { %v1216_v61 = vmul.f32 1.442695, %v1183_v60 }
 0x346   :  { %2847 = vpow2.f32 %v1220_v16 }
 0x347   :  { %2849 = vpow2.f32 %v1216_v61 }
 0x34c   :  { %v3604_v62 = vpop.eup %2843 }
 0x34d   :  { %1282 = vadd.xlane.f32.xlu0 %v3604_v62  ;;  %v1131_v9 = vpop.xlane.xlu0 %1130  ;;  %v3608_v63 = vpop.eup %2845 }
 0x34e   :  { %v1188_v23 = vsub.f32 %v3438_v33, %v1131_v9 }
 0x34f   :  { %v1133_v0 = vpop.xlane.xlu1 %1132 }
 0x350   :  { %v3610_v1 = vpop.eup %2847  ;;  %v1226_v41 = vmul.f32 1.442695, %v1188_v23  ;;  %v1189_v38 = vsub.f32 %v3443_v35, %v1133_v0 }
 0x351   :  { %1284 = vadd.xlane.f32.xlu1 %v3610_v1  ;;  %1278 = vadd.xlane.f32.xlu0 %v3608_v63  ;;  %v1127_v3 = vpop.xlane.xlu0 %1126  ;;  %v3616_v45 = vpop.eup %2849 }
 0x352   :  { %2851 = vpow2.f32 %v1226_v41  ;;  %v1228_v4 = vmul.f32 1.442695, %v1189_v38  ;;  %v1186_v12 = vsub.f32 %v3448_v36, %v1127_v3 }
 0x353   :  { %v1129_v15 = vpop.xlane.xlu1 %1128 }
 0x354   :  { %2853 = vpow2.f32 %v1228_v4  ;;  %v1222_v33 = vmul.f32 1.442695, %v1186_v12  ;;  %v1187_v11 = vsub.f32 %v3453_v37, %v1129_v15 }
 0x355   :  { %1280 = vadd.xlane.f32.xlu1 %v3616_v45 }
 0x356   :  { %2855 = vpow2.f32 %v1222_v33  ;;  %v1224_v35 = vmul.f32 1.442695, %v1187_v11 }
 0x358   :  { %2857 = vpow2.f32 %v1224_v35 }
 0x35c   :  { %v3620_v21 = vpop.eup %2851 }
 0x35d   :  { %1290 = vadd.xlane.f32.xlu0 %v3620_v21  ;;  %v1139_v22 = vpop.xlane.xlu0 %1138 }
 0x35e   :  { %v3623_v7 = vpop.eup %2853  ;;  %v1192_v36 = vsub.f32 %v3462_v53, %v1139_v22 }
 0x35f   :  { %v1141_v24 = vpop.xlane.xlu1 %1140  ;;  %1292 = vadd.xlane.f32.xlu1 %v3623_v7 }
 0x360   :  { %v3627_v8 = vpop.eup %2855  ;;  %v1234_v37 = vmul.f32 1.442695, %v1192_v36  ;;  %v1193_v5 = vsub.f32 %v3467_v55, %v1141_v24 }
 0x361   :  { %1286 = vadd.xlane.f32.xlu0 %v3627_v8  ;;  %v1135_v29 = vpop.xlane.xlu0 %1134 }
 0x362   :  { %v3631_v30 = vpop.eup %2857  ;;  %2859 = vpow2.f32 %v1234_v37  ;;  %v1236_v32 = vmul.f32 1.442695, %v1193_v5  ;;  %v1190_v40 = vsub.f32 %v3472_v56, %v1135_v29 }
 0x363   :  { %v1137_v43 = vpop.xlane.xlu1 %1136  ;;  %1288 = vadd.xlane.f32.xlu1 %v3631_v30 }
 0x364   :  { %2861 = vpow2.f32 %v1236_v32  ;;  %v1230_v53 = vmul.f32 1.442695, %v1190_v40  ;;  %v1191_v44 = vsub.f32 %v3477_v57, %v1137_v43 }
 0x366   :  { %2863 = vpow2.f32 %v1230_v53  ;;  %v1232_v46 = vmul.f32 1.442695, %v1191_v44 }
 0x368   :  { %2865 = vpow2.f32 %v1232_v46 }
 0x36c   :  { %v3636_v55 = vpop.eup %2859 }
 0x36d   :  { %1298 = vadd.xlane.f32.xlu0 %v3636_v55  ;;  %v1147_v47 = vpop.xlane.xlu0 %1146 }
 0x36e   :  { %v3639_v49 = vpop.eup %2861  ;;  %v1196_v54 = vsub.f32 %v3486_v2, %v1147_v47 }
 0x36f   :  { %v1149_v56 = vpop.xlane.xlu1 %1148  ;;  %1300 = vadd.xlane.f32.xlu1 %v3639_v49 }
 0x370   :  { %v3643_v58 = vpop.eup %2863  ;;  %v1242_v59 = vmul.f32 1.442695, %v1196_v54  ;;  %v1197_v57 = vsub.f32 %v3491_v17, %v1149_v56 }
 0x371   :  { %1294 = vadd.xlane.f32.xlu0 %v3643_v58  ;;  %v1143_v60 = vpop.xlane.xlu0 %1142 }
 0x372   :  { %v3647_v16 = vpop.eup %2865  ;;  %2867 = vpow2.f32 %v1242_v59  ;;  %v1244_v61 = vmul.f32 1.442695, %v1197_v57  ;;  %v1194_v9 = vsub.f32 %v3496_v18, %v1143_v60 }
 0x373   :  { %v1145_v23 = vpop.xlane.xlu1 %1144  ;;  %1296 = vadd.xlane.f32.xlu1 %v3647_v16 }
 0x374   :  { %2869 = vpow2.f32 %v1244_v61  ;;  %v1238_v2 = vmul.f32 1.442695, %v1194_v9  ;;  %v1195_v0 = vsub.f32 %v3501_v19, %v1145_v23 }
 0x376   :  { %2871 = vpow2.f32 %v1238_v2  ;;  %v1240_v41 = vmul.f32 1.442695, %v1195_v0 }
 0x378   :  { %2873 = vpow2.f32 %v1240_v41 }
 0x37c   :  { %v3652_v17 = vpop.eup %2867 }
 0x37d   :  { %1306 = vadd.xlane.f32.xlu0 %v3652_v17  ;;  %v1155_v38 = vpop.xlane.xlu0 %1154 }
 0x37e   :  { %v3655_v3 = vpop.eup %2869  ;;  %v1200_v4 = vsub.f32 %v3510_v25, %v1155_v38 }
 0x37f   :  { %v1157_v18 = vpop.xlane.xlu1 %1156  ;;  %1308 = vadd.xlane.f32.xlu1 %v3655_v3 }
 0x380   :  { %v3659_v12 = vpop.eup %2871  ;;  %v1250_v15 = vmul.f32 1.442695, %v1200_v4  ;;  %v1201_v19 = vsub.f32 %v3515_v26, %v1157_v18 }
 0x381   :  { %1302 = vadd.xlane.f32.xlu0 %v3659_v12  ;;  %v1151_v33 = vpop.xlane.xlu0 %1150 }
 0x382   :  { %v3663_v11 = vpop.eup %2873  ;;  %2875 = vpow2.f32 %v1250_v15  ;;  %v1252_v35 = vmul.f32 1.442695, %v1201_v19  ;;  %v1198_v22 = vsub.f32 %v3520_v27, %v1151_v33 }
 0x383   :  { %v1153_v36 = vpop.xlane.xlu1 %1152  ;;  %1304 = vadd.xlane.f32.xlu1 %v3663_v11 }
 0x384   :  { %2877 = vpow2.f32 %v1252_v35  ;;  %v1246_v25 = vmul.f32 1.442695, %v1198_v22  ;;  %v1199_v24 = vsub.f32 %v3525_v28, %v1153_v36 }
 0x386   :  { %2879 = vpow2.f32 %v1246_v25  ;;  %v1248_v37 = vmul.f32 1.442695, %v1199_v24 }
 0x388   :  { %2881 = vpow2.f32 %v1248_v37 }
 0x38c   :  { %v3668_v26 = vpop.eup %2875 }
 0x38d   :  { %1314 = vadd.xlane.f32.xlu0 %v3668_v26  ;;  %v1163_v5 = vpop.xlane.xlu0 %1162 }
 0x38e   :  { %v3671_v29 = vpop.eup %2877  ;;  %v1204_v32 = vsub.f32 %v3534_v48, %v1163_v5 }
 0x38f   :  { %v1165_v27 = vpop.xlane.xlu1 %1164  ;;  %1316 = vadd.xlane.f32.xlu1 %v3671_v29 }
 0x390   :  { %v3675_v40 = vpop.eup %2879  ;;  %v1258_v43 = vmul.f32 1.442695, %v1204_v32  ;;  %v1205_v28 = vsub.f32 %v3539_v50, %v1165_v27 }
 0x391   :  { %1310 = vadd.xlane.f32.xlu0 %v3675_v40  ;;  %v1159_v53 = vpop.xlane.xlu0 %1158 }
 0x392   :  { %v3679_v44 = vpop.eup %2881  ;;  %2883 = vpow2.f32 %v1258_v43  ;;  %v1260_v46 = vmul.f32 1.442695, %v1205_v28  ;;  %v1202_v47 = vsub.f32 %v3544_v51, %v1159_v53 }
 0x393   :  { %v1161_v54 = vpop.xlane.xlu1 %1160  ;;  %1312 = vadd.xlane.f32.xlu1 %v3679_v44 }
 0x394   :  { %2885 = vpow2.f32 %v1260_v46  ;;  %v1254_v48 = vmul.f32 1.442695, %v1202_v47  ;;  %v1203_v56 = vsub.f32 %v3549_v52, %v1161_v54  ;;  %v2996_v54 = vmov 1966171168  }
 0x396   :  { %2887 = vpow2.f32 %v1254_v48  ;;  %v1256_v59 = vmul.f32 1.442695, %v1203_v56  ;;  %v1440_v48 = vunpack.c.l.s4 %v2996_v54 }
 0x398   :  { %2889 = vpow2.f32 %v1256_v59  ;;  %v1441_v59 = vunpack.c.0.s8 %v1440_v48 }
 0x39c   :  { %v3684_v50 = vpop.eup %2883 }
 0x39d   :  { %1322 = vadd.xlane.f32.xlu0 %v3684_v50  ;;  %v1171_v57 = vpop.xlane.xlu0 %1170 }
 0x39e   :  { %v3687_v60 = vpop.eup %2885  ;;  %v1208_v61 = vsub.f32 %v3558_v6, %v1171_v57 }
 0x39f   :  { %v1173_v51 = vpop.xlane.xlu1 %1172  ;;  %1324 = vadd.xlane.f32.xlu1 %v3687_v60 }
 0x3a0   :  { %v3691_v9 = vpop.eup %2887  ;;  %v1266_v23 = vmul.f32 1.442695, %v1208_v61  ;;  %v1209_v52 = vsub.f32 %v3563_v20, %v1173_v51  ;;  %v3729_v51 = vsub.s32 %v1441_v59, %v3241_v10 }
 0x3a1   :  { %1318 = vadd.xlane.f32.xlu0 %v3691_v9  ;;  %v1167_v2 = vpop.xlane.xlu0 %1166 }
 0x3a2   :  { %v3695_v0 = vpop.eup %2889  ;;  %2891 = vpow2.f32 %v1266_v23  ;;  %v1268_v41 = vmul.f32 1.442695, %v1209_v52  ;;  %v1206_v38 = vsub.f32 %v3568_v42, %v1167_v2 }
 0x3a3   :  { %v1169_v4 = vpop.xlane.xlu1 %1168  ;;  %1320 = vadd.xlane.f32.xlu1 %v3695_v0 }
 0x3a4   :  { %2893 = vpow2.f32 %v1268_v41  ;;  %v1262_v6 = vmul.f32 1.442695, %v1206_v38  ;;  %v1207_v18 = vsub.f32 %v3573_v14, %v1169_v4 }
 0x3a6   :  { %2895 = vpow2.f32 %v1262_v6  ;;  %v1264_v15 = vmul.f32 1.442695, %v1207_v18 }
 0x3a8   :  { %2897 = vpow2.f32 %v1264_v15 }
 0x3ac   :  { %v3700_v20 = vpop.eup %2891 }
 0x3ad   :  { %1330 = vadd.xlane.f32.xlu0 %v3700_v20 }
 0x3ae   :  { %v3703_v19 = vpop.eup %2893  ;;  %v1175_v33 = vpop.xlane.xlu0 %1174 }
 0x3af   :  { %v1210_v35 = vsub.f32 %v3582_v31, %v1175_v33  ;;  %1332 = vadd.xlane.f32.xlu1 %v3703_v19 }
 0x3b0   :  { %v3707_v42 = vpop.eup %2895  ;;  %v1177_v22 = vpop.xlane.xlu1 %1176 }
 0x3b1   :  { %v1270_v36 = vmul.f32 1.442695, %v1210_v35  ;;  %v1211_v14 = vsub.f32 %v3587_v34, %v1177_v22  ;;  %1326 = vadd.xlane.f32.xlu0 %v3707_v42 }
 0x3b2   :  { %v3711_v25 = vpop.eup %2897  ;;  %v1179_v24 = vpop.xlane.xlu0 %1178 }
 0x3b3   :  { %2899 = vpow2.f32 %v1270_v36  ;;  %v1272_v37 = vmul.f32 1.442695, %v1211_v14  ;;  %v1212_v5 = vsub.f32 %v3592_v39, %v1179_v24  ;;  %1328 = vadd.xlane.f32.xlu1 %v3711_v25 }
 0x3b4   :  { %v1181_v31 = vpop.xlane.xlu1 %1180 }
 0x3b5   :  { %2901 = vpow2.f32 %v1272_v37  ;;  %v1274_v32 = vmul.f32 1.442695, %v1212_v5  ;;  %v1213_v27 = vsub.f32 %v3597_v13, %v1181_v31 }
 0x3b7   :  { %2903 = vpow2.f32 %v1274_v32  ;;  %v1276_v43 = vmul.f32 1.442695, %v1213_v27 }
 0x3b9   :  { %2905 = vpow2.f32 %v1276_v43 }
 0x3bd   :  { %v3716_v34 = vpop.eup %2899 }
 0x3be   :  { %1334 = vadd.xlane.f32.xlu0 %v3716_v34 }
 0x3bf   :  { %v3719_v28 = vpop.eup %2901 }
 0x3c0   :  { %1336 = vadd.xlane.f32.xlu1 %v3719_v28 }
 0x3c1   :  { %v3722_v53 = vpop.eup %2903 }
 0x3c2   :  { %1338 = vadd.xlane.f32.xlu0 %v3722_v53 }
 0x3c3   :  { %v3725_v39 = vpop.eup %2905 }
 0x3c4   :  { %1340 = vadd.xlane.f32.xlu1 %v3725_v39 }
 0x3da   :  { %v1283_v13 = vpop.xlane.xlu0 %1282 }
 0x3db   :  { %2907 = vrcp.f32 %v1283_v13 }
 0x3de   :  { %v1285_v46 = vpop.xlane.xlu1 %1284  ;;  %v1279_v47 = vpop.xlane.xlu0 %1278 }
 0x3df   :  { %2909 = vrcp.f32 %v1285_v46 }
 0x3e0   :  { %2911 = vrcp.f32 %v1279_v47 }
 0x3e2   :  { %v1281_v56 = vpop.xlane.xlu1 %1280 }
 0x3e3   :  { %2913 = vrcp.f32 %v1281_v56 }
 0x3e5   :  { %v2908_v57 = vpop.eup %2907 }
 0x3e6   :  { %v1376_v23 = vmul.f32 %v2908_v57, %v3604_v62 }
 0x3e9   :  { %v2910_v61 = vpop.eup %2909 }
 0x3ea   :  { %v1377_v52 = vmul.f32 %v2910_v61, %v3610_v1  ;;  %v1291_v2 = vpop.xlane.xlu0 %1290  ;;  %v2912_v41 = vpop.eup %2911 }
 0x3eb   :  { %2915 = vrcp.f32 %v1291_v2  ;;  %v1374_v22 = vmul.f32 %v2912_v41, %v3608_v63 }
 0x3ec   :  { %v1407_v38 = vpack.c.bf16 %v1377_v52, %v1376_v23  ;;  %v2555_v4 = vpack.c.bf16 %v1377_v52, %v1377_v52  ;;  %v1293_v6 = vpop.xlane.xlu1 %1292 }
 0x3ed   :  { %v2914_v18 = vpop.eup %2913  ;;  %2917 = vrcp.f32 %v1293_v6 }
 0x3ee   :  { %v1494_v15 = vrot.slane %v1407_v38, %v3729_v51  ;;  %v1501_v33 = vrot.slane %v2555_v4, %v3729_v51  ;;  %v1375_v35 = vmul.f32 %v2914_v18, %v3616_v45  ;;  %v1287_v10 = vpop.xlane.xlu0 %1286 }
 0x3ef   :  { %2919 = vrcp.f32 %v1287_v10 }
 0x3f0   :  { %v1502_v62 = vcombine.high %v1494_v15, %v1494_v15  ;;  %v1503_v1 = vcombine.high %v1501_v33, %v1501_v33  ;;  %v1510_v36 = vrot.slane %v1494_v15, %v3729_v51  ;;  %v1517_v14 = vrot.slane %v1501_v33, %v3729_v51  ;;  %2574 = vst.sshfl [vmem:[#allocation2 + $0x8] sm:$0x1 pattern:$0x73625140] %v1494_v15  ;;  %v1289_v24 = vpop.xlane.xlu1 %1288 }
 0x3f1   :  { %2576 = vst.sshfl [vmem:[#allocation2 + $0xc] sm:$0x1 pattern:$0x73625140] %v1501_v33  ;;  %v1406_v37 = vpack.c.bf16 %v1375_v35, %v1374_v22  ;;  %v2554_v5 = vpack.c.bf16 %v1375_v35, %v1375_v35  ;;  %2921 = vrcp.f32 %v1289_v24 }
 0x3f2   :  { %v1524_v31 = vrot.slane %v1502_v62, %v3729_v51  ;;  %v1531_v45 = vrot.slane %v1503_v1, %v3729_v51  ;;  %v1532_v32 = vcombine.high %v1510_v36, %v1510_v36  ;;  %v1533_v27 = vcombine.high %v1517_v14, %v1517_v14  ;;  %2575 = vst.sshfl [vmem:[#allocation2 + $0x9] sm:$0x1 pattern:$0x73625140] %v1502_v62 }
 0x3f3   :  { %2577 = vst.sshfl [vmem:[#allocation2 + $0xd] sm:$0x1 pattern:$0x73625140] %v1503_v1  ;;  %v1445_v63 = vrot.slane %v1406_v37, %v3729_v51  ;;  %v1452_v43 = vrot.slane %v2554_v5, %v3729_v51 }
 0x3f4   :  { %v1534_v13 = vcombine.high %v1524_v31, %v1524_v31  ;;  %v1535_v46 = vcombine.high %v1531_v45, %v1531_v45  ;;  %2360 = vst [vmem:[#allocation2 + $0xa] sm:$0x1] %v1532_v32  ;;  %2364 = vst [vmem:[#allocation2 + $0xe] sm:$0x1] %v1533_v27 }
 0x3f5   :  { %v2916_v47 = vpop.eup %2915  ;;  %v1453_v54 = vcombine.high %v1445_v63, %v1445_v63  ;;  %v1454_v48 = vcombine.high %v1452_v43, %v1452_v43  ;;  %v1461_v56 = vrot.slane %v1445_v63, %v3729_v51  ;;  %v1468_v59 = vrot.slane %v1452_v43, %v3729_v51  ;;  %2570 = vst.sshfl [vmem:[#allocation2] sm:$0x1 pattern:$0x73625140] %v1445_v63 }
 0x3f6   :  { %2572 = vst.sshfl [vmem:[#allocation2 + $0x4] sm:$0x1 pattern:$0x73625140] %v1452_v43  ;;  %2361 = vst [vmem:[#allocation2 + $0xb] sm:$0x1] %v1534_v13  ;;  %v1380_v41 = vmul.f32 %v2916_v47, %v3620_v21 }
 0x3f7   :  { %2365 = vst [vmem:[#allocation2 + $0xf] sm:$0x1] %v1535_v46  ;;  %v2918_v57 = vpop.eup %2917  ;;  %v1475_v61 = vrot.slane %v1453_v54, %v3729_v51  ;;  %v1482_v23 = vrot.slane %v1454_v48, %v3729_v51  ;;  %v1483_v52 = vcombine.high %v1461_v56, %v1461_v56  ;;  %v1484_v2 = vcombine.high %v1468_v59, %v1468_v59 }
 0x3f8   :  { %2571 = vst.sshfl [vmem:[#allocation2 + $0x1] sm:$0x1 pattern:$0x73625140] %v1453_v54  ;;  %v1381_v38 = vmul.f32 %v2918_v57, %v3623_v7 }
 0x3f9   :  { %2573 = vst.sshfl [vmem:[#allocation2 + $0x5] sm:$0x1 pattern:$0x73625140] %v1454_v48  ;;  %v2920_v4 = vpop.eup %2919  ;;  %v1485_v6 = vcombine.high %v1475_v61, %v1475_v61  ;;  %v1486_v18 = vcombine.high %v1482_v23, %v1482_v23  ;;  %2352 = vst [vmem:[#allocation2 + $0x2] sm:$0x1] %v1483_v52 }
 0x3fa   :  { %2356 = vst [vmem:[#allocation2 + $0x6] sm:$0x1] %v1484_v2  ;;  %v1409_v15 = vpack.c.bf16 %v1381_v38, %v1380_v41  ;;  %v2557_v33 = vpack.c.bf16 %v1381_v38, %v1381_v38  ;;  %v1299_v35 = vpop.xlane.xlu0 %1298  ;;  %v1378_v7 = vmul.f32 %v2920_v4, %v3627_v8 }
 0x3fb   :  { %v2922_v10 = vpop.eup %2921  ;;  %2353 = vst [vmem:[#allocation2 + $0x3] sm:$0x1] %v1485_v6  ;;  %2357 = vst [vmem:[#allocation2 + $0x7] sm:$0x1] %v1486_v18  ;;  %2923 = vrcp.f32 %v1299_v35 }
 0x3fc   :  { %v1592_v22 = vrot.slane %v1409_v15, %v3729_v51  ;;  %v1599_v62 = vrot.slane %v2557_v33, %v3729_v51  ;;  %v1379_v21 = vmul.f32 %v2922_v10, %v3631_v30  ;;  %v1301_v1 = vpop.xlane.xlu1 %1300 }
 0x3fd   :  { %2925 = vrcp.f32 %v1301_v1 }
 0x3fe   :  { %v1600_v36 = vcombine.high %v1592_v22, %v1592_v22  ;;  %v1601_v14 = vcombine.high %v1599_v62, %v1599_v62  ;;  %v1608_v24 = vrot.slane %v1592_v22, %v3729_v51  ;;  %v1615_v37 = vrot.slane %v1599_v62, %v3729_v51  ;;  %2582 = vst.sshfl [vmem:[#allocation2 + $0x18] sm:$0x1 pattern:$0x73625140] %v1592_v22  ;;  %v1295_v5 = vpop.xlane.xlu0 %1294 }
 0x3ff   :  { %2584 = vst.sshfl [vmem:[#allocation2 + $0x1c] sm:$0x1 pattern:$0x73625140] %v1599_v62  ;;  %v1408_v31 = vpack.c.bf16 %v1379_v21, %v1378_v7  ;;  %v2556_v45 = vpack.c.bf16 %v1379_v21, %v1379_v21  ;;  %2927 = vrcp.f32 %v1295_v5 }
 0x400   :  { %v1622_v32 = vrot.slane %v1600_v36, %v3729_v51  ;;  %v1629_v30 = vrot.slane %v1601_v14, %v3729_v51  ;;  %v1630_v27 = vcombine.high %v1608_v24, %v1608_v24  ;;  %v1631_v63 = vcombine.high %v1615_v37, %v1615_v37  ;;  %2583 = vst.sshfl [vmem:[#allocation2 + $0x19] sm:$0x1 pattern:$0x73625140] %v1600_v36  ;;  %v1297_v8 = vpop.xlane.xlu1 %1296 }
 0x401   :  { %2585 = vst.sshfl [vmem:[#allocation2 + $0x1d] sm:$0x1 pattern:$0x73625140] %v1601_v14  ;;  %v1543_v43 = vrot.slane %v1408_v31, %v3729_v51  ;;  %v1550_v13 = vrot.slane %v2556_v45, %v3729_v51  ;;  %2929 = vrcp.f32 %v1297_v8 }
 0x402   :  { %v1632_v46 = vcombine.high %v1622_v32, %v1622_v32  ;;  %v1633_v47 = vcombine.high %v1629_v30, %v1629_v30  ;;  %2376 = vst [vmem:[#allocation2 + $0x1a] sm:$0x1] %v1630_v27  ;;  %2380 = vst [vmem:[#allocation2 + $0x1e] sm:$0x1] %v1631_v63 }
 0x403   :  { %v1551_v54 = vcombine.high %v1543_v43, %v1543_v43  ;;  %v1552_v48 = vcombine.high %v1550_v13, %v1550_v13  ;;  %v1559_v56 = vrot.slane %v1543_v43, %v3729_v51  ;;  %v1566_v59 = vrot.slane %v1550_v13, %v3729_v51  ;;  %2578 = vst.sshfl [vmem:[#allocation2 + $0x10] sm:$0x1 pattern:$0x73625140] %v1543_v43 }
 0x404   :  { %2580 = vst.sshfl [vmem:[#allocation2 + $0x14] sm:$0x1 pattern:$0x73625140] %v1550_v13  ;;  %2377 = vst [vmem:[#allocation2 + $0x1b] sm:$0x1] %v1632_v46 }
 0x405   :  { %2381 = vst [vmem:[#allocation2 + $0x1f] sm:$0x1] %v1633_v47  ;;  %v2924_v57 = vpop.eup %2923  ;;  %v1573_v61 = vrot.slane %v1551_v54, %v3729_v51  ;;  %v1580_v23 = vrot.slane %v1552_v48, %v3729_v51  ;;  %v1581_v52 = vcombine.high %v1559_v56, %v1559_v56  ;;  %v1582_v2 = vcombine.high %v1566_v59, %v1566_v59 }
 0x406   :  { %2579 = vst.sshfl [vmem:[#allocation2 + $0x11] sm:$0x1 pattern:$0x73625140] %v1551_v54  ;;  %v1384_v6 = vmul.f32 %v2924_v57, %v3636_v55 }
 0x407   :  { %2581 = vst.sshfl [vmem:[#allocation2 + $0x15] sm:$0x1 pattern:$0x73625140] %v1552_v48  ;;  %v2926_v41 = vpop.eup %2925  ;;  %v1583_v38 = vcombine.high %v1573_v61, %v1573_v61  ;;  %v1584_v4 = vcombine.high %v1580_v23, %v1580_v23  ;;  %2368 = vst [vmem:[#allocation2 + $0x12] sm:$0x1] %v1581_v52 }
 0x408   :  { %2372 = vst [vmem:[#allocation2 + $0x16] sm:$0x1] %v1582_v2  ;;  %v1385_v18 = vmul.f32 %v2926_v41, %v3639_v49 }
 0x409   :  { %v2928_v15 = vpop.eup %2927  ;;  %2369 = vst [vmem:[#allocation2 + $0x13] sm:$0x1] %v1583_v38  ;;  %2373 = vst [vmem:[#allocation2 + $0x17] sm:$0x1] %v1584_v4 }
 0x40a   :  { %v1411_v33 = vpack.c.bf16 %v1385_v18, %v1384_v6  ;;  %v2559_v35 = vpack.c.bf16 %v1385_v18, %v1385_v18  ;;  %v1307_v10 = vpop.xlane.xlu0 %1306  ;;  %v1382_v36 = vmul.f32 %v2928_v15, %v3643_v58 }
 0x40b   :  { %v2930_v22 = vpop.eup %2929  ;;  %2931 = vrcp.f32 %v1307_v10 }
 0x40c   :  { %v1690_v62 = vrot.slane %v1411_v33, %v3729_v51  ;;  %v1697_v21 = vrot.slane %v2559_v35, %v3729_v51  ;;  %v1383_v1 = vmul.f32 %v2930_v22, %v3647_v16  ;;  %v1309_v7 = vpop.xlane.xlu1 %1308 }
 0x40d   :  { %2933 = vrcp.f32 %v1309_v7 }
 0x40e   :  { %v1698_v55 = vcombine.high %v1690_v62, %v1690_v62  ;;  %v1699_v49 = vcombine.high %v1697_v21, %v1697_v21  ;;  %v1706_v14 = vrot.slane %v1690_v62, %v3729_v51  ;;  %v1713_v24 = vrot.slane %v1697_v21, %v3729_v51  ;;  %2590 = vst.sshfl [vmem:[#allocation2 + $0x28] sm:$0x1 pattern:$0x73625140] %v1690_v62  ;;  %v1303_v37 = vpop.xlane.xlu0 %1302 }
 0x40f   :  { %2592 = vst.sshfl [vmem:[#allocation2 + $0x2c] sm:$0x1 pattern:$0x73625140] %v1697_v21  ;;  %v1410_v5 = vpack.c.bf16 %v1383_v1, %v1382_v36  ;;  %v2558_v31 = vpack.c.bf16 %v1383_v1, %v1383_v1  ;;  %2935 = vrcp.f32 %v1303_v37 }
 0x410   :  { %v1720_v45 = vrot.slane %v1698_v55, %v3729_v51  ;;  %v1727_v16 = vrot.slane %v1699_v49, %v3729_v51  ;;  %v1728_v32 = vcombine.high %v1706_v14, %v1706_v14  ;;  %v1729_v30 = vcombine.high %v1713_v24, %v1713_v24  ;;  %2591 = vst.sshfl [vmem:[#allocation2 + $0x29] sm:$0x1 pattern:$0x73625140] %v1698_v55  ;;  %v1305_v58 = vpop.xlane.xlu1 %1304 }
 0x411   :  { %2593 = vst.sshfl [vmem:[#allocation2 + $0x2d] sm:$0x1 pattern:$0x73625140] %v1699_v49  ;;  %v1641_v27 = vrot.slane %v1410_v5, %v3729_v51  ;;  %v1648_v63 = vrot.slane %v2558_v31, %v3729_v51  ;;  %2937 = vrcp.f32 %v1305_v58 }
 0x412   :  { %v1730_v8 = vcombine.high %v1720_v45, %v1720_v45  ;;  %v1731_v43 = vcombine.high %v1727_v16, %v1727_v16  ;;  %2392 = vst [vmem:[#allocation2 + $0x2a] sm:$0x1] %v1728_v32  ;;  %2396 = vst [vmem:[#allocation2 + $0x2e] sm:$0x1] %v1729_v30 }
 0x413   :  { %v1649_v13 = vcombine.high %v1641_v27, %v1641_v27  ;;  %v1650_v46 = vcombine.high %v1648_v63, %v1648_v63  ;;  %v1657_v47 = vrot.slane %v1641_v27, %v3729_v51  ;;  %v1664_v54 = vrot.slane %v1648_v63, %v3729_v51  ;;  %2586 = vst.sshfl [vmem:[#allocation2 + $0x20] sm:$0x1 pattern:$0x73625140] %v1641_v27 }
 0x414   :  { %2588 = vst.sshfl [vmem:[#allocation2 + $0x24] sm:$0x1 pattern:$0x73625140] %v1648_v63  ;;  %2393 = vst [vmem:[#allocation2 + $0x2b] sm:$0x1] %v1730_v8 }
 0x415   :  { %2397 = vst [vmem:[#allocation2 + $0x2f] sm:$0x1] %v1731_v43  ;;  %v2932_v48 = vpop.eup %2931  ;;  %v1671_v56 = vrot.slane %v1649_v13, %v3729_v51  ;;  %v1678_v59 = vrot.slane %v1650_v46, %v3729_v51  ;;  %v1679_v57 = vcombine.high %v1657_v47, %v1657_v47  ;;  %v1680_v61 = vcombine.high %v1664_v54, %v1664_v54 }
 0x416   :  { %2587 = vst.sshfl [vmem:[#allocation2 + $0x21] sm:$0x1 pattern:$0x73625140] %v1649_v13  ;;  %v1388_v41 = vmul.f32 %v2932_v48, %v3652_v17 }
 0x417   :  { %2589 = vst.sshfl [vmem:[#allocation2 + $0x25] sm:$0x1 pattern:$0x73625140] %v1650_v46  ;;  %v2934_v23 = vpop.eup %2933  ;;  %v1681_v52 = vcombine.high %v1671_v56, %v1671_v56  ;;  %v1682_v2 = vcombine.high %v1678_v59, %v1678_v59  ;;  %2384 = vst [vmem:[#allocation2 + $0x22] sm:$0x1] %v1679_v57 }
 0x418   :  { %2388 = vst [vmem:[#allocation2 + $0x26] sm:$0x1] %v1680_v61  ;;  %v1389_v38 = vmul.f32 %v2934_v23, %v3655_v3 }
 0x419   :  { %v2936_v4 = vpop.eup %2935  ;;  %2385 = vst [vmem:[#allocation2 + $0x23] sm:$0x1] %v1681_v52  ;;  %2389 = vst [vmem:[#allocation2 + $0x27] sm:$0x1] %v1682_v2 }
 0x41a   :  { %v1413_v6 = vpack.c.bf16 %v1389_v38, %v1388_v41  ;;  %v2561_v18 = vpack.c.bf16 %v1389_v38, %v1389_v38  ;;  %v1315_v15 = vpop.xlane.xlu0 %1314  ;;  %v1386_v21 = vmul.f32 %v2936_v4, %v3659_v12 }
 0x41b   :  { %v2938_v33 = vpop.eup %2937  ;;  %2939 = vrcp.f32 %v1315_v15 }
 0x41c   :  { %v1788_v35 = vrot.slane %v1413_v6, %v3729_v51  ;;  %v1795_v10 = vrot.slane %v2561_v18, %v3729_v51  ;;  %v1387_v22 = vmul.f32 %v2938_v33, %v3663_v11  ;;  %v1317_v62 = vpop.xlane.xlu1 %1316 }
 0x41d   :  { %2941 = vrcp.f32 %v1317_v62 }
 0x41e   :  { %v1796_v17 = vcombine.high %v1788_v35, %v1788_v35  ;;  %v1797_v3 = vcombine.high %v1795_v10, %v1795_v10  ;;  %v1804_v1 = vrot.slane %v1788_v35, %v3729_v51  ;;  %v1811_v7 = vrot.slane %v1795_v10, %v3729_v51  ;;  %2598 = vst.sshfl [vmem:[#allocation2 + $0x38] sm:$0x1 pattern:$0x73625140] %v1788_v35  ;;  %v1311_v36 = vpop.xlane.xlu0 %1310 }
 0x41f   :  { %2600 = vst.sshfl [vmem:[#allocation2 + $0x3c] sm:$0x1 pattern:$0x73625140] %v1795_v10  ;;  %v1412_v55 = vpack.c.bf16 %v1387_v22, %v1386_v21  ;;  %v2560_v49 = vpack.c.bf16 %v1387_v22, %v1387_v22  ;;  %2943 = vrcp.f32 %v1311_v36 }
 0x420   :  { %v1818_v14 = vrot.slane %v1796_v17, %v3729_v51  ;;  %v1825_v11 = vrot.slane %v1797_v3, %v3729_v51  ;;  %v1826_v24 = vcombine.high %v1804_v1, %v1804_v1  ;;  %v1827_v37 = vcombine.high %v1811_v7, %v1811_v7  ;;  %2599 = vst.sshfl [vmem:[#allocation2 + $0x39] sm:$0x1 pattern:$0x73625140] %v1796_v17  ;;  %v1313_v12 = vpop.xlane.xlu1 %1312 }
 0x421   :  { %2601 = vst.sshfl [vmem:[#allocation2 + $0x3d] sm:$0x1 pattern:$0x73625140] %v1797_v3  ;;  %v1739_v5 = vrot.slane %v1412_v55, %v3729_v51  ;;  %v1746_v31 = vrot.slane %v2560_v49, %v3729_v51  ;;  %2945 = vrcp.f32 %v1313_v12 }
 0x422   :  { %v1828_v45 = vcombine.high %v1818_v14, %v1818_v14  ;;  %v1829_v16 = vcombine.high %v1825_v11, %v1825_v11  ;;  %2408 = vst [vmem:[#allocation2 + $0x3a] sm:$0x1] %v1826_v24  ;;  %2412 = vst [vmem:[#allocation2 + $0x3e] sm:$0x1] %v1827_v37 }
 0x423   :  { %v1747_v32 = vcombine.high %v1739_v5, %v1739_v5  ;;  %v1748_v30 = vcombine.high %v1746_v31, %v1746_v31  ;;  %v1755_v58 = vrot.slane %v1739_v5, %v3729_v51  ;;  %v1762_v27 = vrot.slane %v1746_v31, %v3729_v51  ;;  %2594 = vst.sshfl [vmem:[#allocation2 + $0x30] sm:$0x1 pattern:$0x73625140] %v1739_v5 }
 0x424   :  { %2596 = vst.sshfl [vmem:[#allocation2 + $0x34] sm:$0x1 pattern:$0x73625140] %v1746_v31  ;;  %2409 = vst [vmem:[#allocation2 + $0x3b] sm:$0x1] %v1828_v45 }
 0x425   :  { %2413 = vst [vmem:[#allocation2 + $0x3f] sm:$0x1] %v1829_v16  ;;  %v2940_v63 = vpop.eup %2939  ;;  %v1769_v8 = vrot.slane %v1747_v32, %v3729_v51  ;;  %v1776_v43 = vrot.slane %v1748_v30, %v3729_v51  ;;  %v1777_v13 = vcombine.high %v1755_v58, %v1755_v58  ;;  %v1778_v46 = vcombine.high %v1762_v27, %v1762_v27 }
 0x426   :  { %2595 = vst.sshfl [vmem:[#allocation2 + $0x31] sm:$0x1 pattern:$0x73625140] %v1747_v32  ;;  %v1392_v56 = vmul.f32 %v2940_v63, %v3668_v26 }
 0x427   :  { %2597 = vst.sshfl [vmem:[#allocation2 + $0x35] sm:$0x1 pattern:$0x73625140] %v1748_v30  ;;  %v2942_v47 = vpop.eup %2941  ;;  %v1779_v54 = vcombine.high %v1769_v8, %v1769_v8  ;;  %v1780_v48 = vcombine.high %v1776_v43, %v1776_v43  ;;  %2400 = vst [vmem:[#allocation2 + $0x32] sm:$0x1] %v1777_v13 }
 0x428   :  { %2404 = vst [vmem:[#allocation2 + $0x36] sm:$0x1] %v1778_v46  ;;  %v1393_v59 = vmul.f32 %v2942_v47, %v3671_v29 }
 0x429   :  { %v2944_v57 = vpop.eup %2943  ;;  %2401 = vst [vmem:[#allocation2 + $0x33] sm:$0x1] %v1779_v54  ;;  %2405 = vst [vmem:[#allocation2 + $0x37] sm:$0x1] %v1780_v48 }
 0x42a   :  { %v1415_v61 = vpack.c.bf16 %v1393_v59, %v1392_v56  ;;  %v2563_v23 = vpack.c.bf16 %v1393_v59, %v1393_v59  ;;  %v1323_v52 = vpop.xlane.xlu0 %1322  ;;  %v1390_v18 = vmul.f32 %v2944_v57, %v3675_v40 }
 0x42b   :  { %v2946_v2 = vpop.eup %2945  ;;  %2947 = vrcp.f32 %v1323_v52 }
 0x42c   :  { %v1886_v41 = vrot.slane %v1415_v61, %v3729_v51  ;;  %v1893_v38 = vrot.slane %v2563_v23, %v3729_v51  ;;  %v1391_v4 = vmul.f32 %v2946_v2, %v3679_v44  ;;  %v1325_v6 = vpop.xlane.xlu1 %1324 }
 0x42d   :  { %2949 = vrcp.f32 %v1325_v6 }
 0x42e   :  { %v1894_v26 = vcombine.high %v1886_v41, %v1886_v41  ;;  %v1895_v29 = vcombine.high %v1893_v38, %v1893_v38  ;;  %v1902_v15 = vrot.slane %v1886_v41, %v3729_v51  ;;  %v1909_v33 = vrot.slane %v1893_v38, %v3729_v51  ;;  %2606 = vst.sshfl [vmem:[#allocation2 + $0x48] sm:$0x1 pattern:$0x73625140] %v1886_v41  ;;  %v1319_v35 = vpop.xlane.xlu0 %1318 }
 0x42f   :  { %2608 = vst.sshfl [vmem:[#allocation2 + $0x4c] sm:$0x1 pattern:$0x73625140] %v1893_v38  ;;  %v1414_v10 = vpack.c.bf16 %v1391_v4, %v1390_v18  ;;  %v2562_v22 = vpack.c.bf16 %v1391_v4, %v1391_v4  ;;  %2951 = vrcp.f32 %v1319_v35 }
 0x430   :  { %v1916_v62 = vrot.slane %v1894_v26, %v3729_v51  ;;  %v1923_v44 = vrot.slane %v1895_v29, %v3729_v51  ;;  %v1924_v21 = vcombine.high %v1902_v15, %v1902_v15  ;;  %v1925_v17 = vcombine.high %v1909_v33, %v1909_v33  ;;  %2607 = vst.sshfl [vmem:[#allocation2 + $0x49] sm:$0x1 pattern:$0x73625140] %v1894_v26  ;;  %v1321_v40 = vpop.xlane.xlu1 %1320 }
 0x431   :  { %2609 = vst.sshfl [vmem:[#allocation2 + $0x4d] sm:$0x1 pattern:$0x73625140] %v1895_v29  ;;  %v1837_v3 = vrot.slane %v1414_v10, %v3729_v51  ;;  %v1844_v1 = vrot.slane %v2562_v22, %v3729_v51  ;;  %2953 = vrcp.f32 %v1321_v40 }
 0x432   :  { %v1926_v7 = vcombine.high %v1916_v62, %v1916_v62  ;;  %v1927_v36 = vcombine.high %v1923_v44, %v1923_v44  ;;  %2424 = vst [vmem:[#allocation2 + $0x4a] sm:$0x1] %v1924_v21  ;;  %2428 = vst [vmem:[#allocation2 + $0x4e] sm:$0x1] %v1925_v17 }
 0x433   :  { %v1845_v55 = vcombine.high %v1837_v3, %v1837_v3  ;;  %v1846_v49 = vcombine.high %v1844_v1, %v1844_v1  ;;  %v1853_v14 = vrot.slane %v1837_v3, %v3729_v51  ;;  %v1860_v11 = vrot.slane %v1844_v1, %v3729_v51  ;;  %2602 = vst.sshfl [vmem:[#allocation2 + $0x40] sm:$0x1 pattern:$0x73625140] %v1837_v3 }
 0x434   :  { %2604 = vst.sshfl [vmem:[#allocation2 + $0x44] sm:$0x1 pattern:$0x73625140] %v1844_v1  ;;  %2425 = vst [vmem:[#allocation2 + $0x4b] sm:$0x1] %v1926_v7 }
 0x435   :  { %2429 = vst [vmem:[#allocation2 + $0x4f] sm:$0x1] %v1927_v36  ;;  %v2948_v24 = vpop.eup %2947  ;;  %v1867_v37 = vrot.slane %v1845_v55, %v3729_v51  ;;  %v1874_v12 = vrot.slane %v1846_v49, %v3729_v51  ;;  %v1875_v5 = vcombine.high %v1853_v14, %v1853_v14  ;;  %v1876_v31 = vcombine.high %v1860_v11, %v1860_v11 }
 0x436   :  { %2603 = vst.sshfl [vmem:[#allocation2 + $0x41] sm:$0x1 pattern:$0x73625140] %v1845_v55  ;;  %v1396_v30 = vmul.f32 %v2948_v24, %v3684_v50 }
 0x437   :  { %2605 = vst.sshfl [vmem:[#allocation2 + $0x45] sm:$0x1 pattern:$0x73625140] %v1846_v49  ;;  %v2950_v45 = vpop.eup %2949  ;;  %v1877_v16 = vcombine.high %v1867_v37, %v1867_v37  ;;  %v1878_v32 = vcombine.high %v1874_v12, %v1874_v12  ;;  %2416 = vst [vmem:[#allocation2 + $0x42] sm:$0x1] %v1875_v5 }
 0x438   :  { %2420 = vst [vmem:[#allocation2 + $0x46] sm:$0x1] %v1876_v31  ;;  %v1397_v58 = vmul.f32 %v2950_v45, %v3687_v60 }
 0x439   :  { %v2952_v27 = vpop.eup %2951  ;;  %2417 = vst [vmem:[#allocation2 + $0x43] sm:$0x1] %v1877_v16  ;;  %2421 = vst [vmem:[#allocation2 + $0x47] sm:$0x1] %v1878_v32 }
 0x43a   :  { %v1417_v63 = vpack.c.bf16 %v1397_v58, %v1396_v30  ;;  %v2565_v8 = vpack.c.bf16 %v1397_v58, %v1397_v58  ;;  %v1331_v43 = vpop.xlane.xlu0 %1330  ;;  %v1394_v56 = vmul.f32 %v2952_v27, %v3691_v9 }
 0x43b   :  { %v2954_v13 = vpop.eup %2953  ;;  %2955 = vrcp.f32 %v1331_v43 }
 0x43c   :  { %v1984_v46 = vrot.slane %v1417_v63, %v3729_v51  ;;  %v1991_v47 = vrot.slane %v2565_v8, %v3729_v51  ;;  %v1395_v54 = vmul.f32 %v2954_v13, %v3695_v0  ;;  %v1333_v48 = vpop.xlane.xlu1 %1332 }
 0x43d   :  { %2957 = vrcp.f32 %v1333_v48 }
 0x43e   :  { %v1992_v50 = vcombine.high %v1984_v46, %v1984_v46  ;;  %v1993_v60 = vcombine.high %v1991_v47, %v1991_v47  ;;  %v2000_v59 = vrot.slane %v1984_v46, %v3729_v51  ;;  %v2007_v57 = vrot.slane %v1991_v47, %v3729_v51  ;;  %2614 = vst.sshfl [vmem:[#allocation2 + $0x58] sm:$0x1 pattern:$0x73625140] %v1984_v46  ;;  %v1327_v61 = vpop.xlane.xlu0 %1326 }
 0x43f   :  { %2616 = vst.sshfl [vmem:[#allocation2 + $0x5c] sm:$0x1 pattern:$0x73625140] %v1991_v47  ;;  %v1416_v23 = vpack.c.bf16 %v1395_v54, %v1394_v56  ;;  %v2564_v52 = vpack.c.bf16 %v1395_v54, %v1395_v54  ;;  %2959 = vrcp.f32 %v1327_v61 }
 0x440   :  { %v2014_v2 = vrot.slane %v1992_v50, %v3729_v51  ;;  %v2021_v0 = vrot.slane %v1993_v60, %v3729_v51  ;;  %v2022_v41 = vcombine.high %v2000_v59, %v2000_v59  ;;  %v2023_v38 = vcombine.high %v2007_v57, %v2007_v57  ;;  %2615 = vst.sshfl [vmem:[#allocation2 + $0x59] sm:$0x1 pattern:$0x73625140] %v1992_v50  ;;  %v1329_v9 = vpop.xlane.xlu1 %1328 }
 0x441   :  { %2617 = vst.sshfl [vmem:[#allocation2 + $0x5d] sm:$0x1 pattern:$0x73625140] %v1993_v60  ;;  %v1935_v4 = vrot.slane %v1416_v23, %v3729_v51  ;;  %v1942_v6 = vrot.slane %v2564_v52, %v3729_v51  ;;  %2961 = vrcp.f32 %v1329_v9 }
 0x442   :  { %v2024_v18 = vcombine.high %v2014_v2, %v2014_v2  ;;  %v2025_v26 = vcombine.high %v2021_v0, %v2021_v0  ;;  %2440 = vst [vmem:[#allocation2 + $0x5a] sm:$0x1] %v2022_v41  ;;  %2444 = vst [vmem:[#allocation2 + $0x5e] sm:$0x1] %v2023_v38 }
 0x443   :  { %v1943_v29 = vcombine.high %v1935_v4, %v1935_v4  ;;  %v1944_v15 = vcombine.high %v1942_v6, %v1942_v6  ;;  %v1951_v33 = vrot.slane %v1935_v4, %v3729_v51  ;;  %v1958_v35 = vrot.slane %v1942_v6, %v3729_v51  ;;  %2610 = vst.sshfl [vmem:[#allocation2 + $0x50] sm:$0x1 pattern:$0x73625140] %v1935_v4 }
 0x444   :  { %2612 = vst.sshfl [vmem:[#allocation2 + $0x54] sm:$0x1 pattern:$0x73625140] %v1942_v6  ;;  %2441 = vst [vmem:[#allocation2 + $0x5b] sm:$0x1] %v2024_v18 }
 0x445   :  { %2445 = vst [vmem:[#allocation2 + $0x5f] sm:$0x1] %v2025_v26  ;;  %v2956_v10 = vpop.eup %2955  ;;  %v1965_v22 = vrot.slane %v1943_v29, %v3729_v51  ;;  %v1972_v62 = vrot.slane %v1944_v15, %v3729_v51  ;;  %v1973_v44 = vcombine.high %v1951_v33, %v1951_v33  ;;  %v1974_v21 = vcombine.high %v1958_v35, %v1958_v35 }
 0x446   :  { %2611 = vst.sshfl [vmem:[#allocation2 + $0x51] sm:$0x1 pattern:$0x73625140] %v1943_v29  ;;  %v1400_v1 = vmul.f32 %v2956_v10, %v3700_v20 }
 0x447   :  { %2613 = vst.sshfl [vmem:[#allocation2 + $0x55] sm:$0x1 pattern:$0x73625140] %v1944_v15  ;;  %v2958_v17 = vpop.eup %2957  ;;  %v1975_v40 = vcombine.high %v1965_v22, %v1965_v22  ;;  %v1976_v3 = vcombine.high %v1972_v62, %v1972_v62  ;;  %2432 = vst [vmem:[#allocation2 + $0x52] sm:$0x1] %v1973_v44 }
 0x448   :  { %2436 = vst [vmem:[#allocation2 + $0x56] sm:$0x1] %v1974_v21  ;;  %v1401_v7 = vmul.f32 %v2958_v17, %v3703_v19 }
 0x449   :  { %v2960_v36 = vpop.eup %2959  ;;  %2433 = vst [vmem:[#allocation2 + $0x53] sm:$0x1] %v1975_v40  ;;  %2437 = vst [vmem:[#allocation2 + $0x57] sm:$0x1] %v1976_v3 }
 0x44a   :  { %v1419_v55 = vpack.c.bf16 %v1401_v7, %v1400_v1  ;;  %v2567_v49 = vpack.c.bf16 %v1401_v7, %v1401_v7  ;;  %v1398_v5 = vmul.f32 %v2960_v36, %v3707_v42 }
 0x44b   :  { %v2962_v14 = vpop.eup %2961  ;;  %v1335_v11 = vpop.xlane.xlu0 %1334 }
 0x44c   :  { %v2082_v24 = vrot.slane %v1419_v55, %v3729_v51  ;;  %v2089_v37 = vrot.slane %v2567_v49, %v3729_v51  ;;  %v1399_v12 = vmul.f32 %v2962_v14, %v3711_v25  ;;  %2963 = vrcp.f32 %v1335_v11 }
 0x44d   :  { %v1337_v31 = vpop.xlane.xlu1 %1336 }
 0x44e   :  { %v2090_v20 = vcombine.high %v2082_v24, %v2082_v24  ;;  %v2091_v45 = vcombine.high %v2089_v37, %v2089_v37  ;;  %v2098_v19 = vrot.slane %v2082_v24, %v3729_v51  ;;  %v2105_v16 = vrot.slane %v2089_v37, %v3729_v51  ;;  %2622 = vst.sshfl [vmem:[#allocation2 + $0x68] sm:$0x1 pattern:$0x73625140] %v2082_v24 }
 0x44f   :  { %2624 = vst.sshfl [vmem:[#allocation2 + $0x6c] sm:$0x1 pattern:$0x73625140] %v2089_v37  ;;  %v1418_v32 = vpack.c.bf16 %v1399_v12, %v1398_v5  ;;  %v2566_v30 = vpack.c.bf16 %v1399_v12, %v1399_v12  ;;  %2965 = vrcp.f32 %v1337_v31  ;;  %v1339_v58 = vpop.xlane.xlu0 %1338 }
 0x450   :  { %v2112_v27 = vrot.slane %v2090_v20, %v3729_v51  ;;  %v2119_v25 = vrot.slane %v2091_v45, %v3729_v51  ;;  %v2120_v63 = vcombine.high %v2098_v19, %v2098_v19  ;;  %v2121_v42 = vcombine.high %v2105_v16, %v2105_v16  ;;  %2623 = vst.sshfl [vmem:[#allocation2 + $0x69] sm:$0x1 pattern:$0x73625140] %v2090_v20 }
 0x451   :  { %2625 = vst.sshfl [vmem:[#allocation2 + $0x6d] sm:$0x1 pattern:$0x73625140] %v2091_v45  ;;  %v2033_v8 = vrot.slane %v1418_v32, %v3729_v51  ;;  %v2040_v43 = vrot.slane %v2566_v30, %v3729_v51  ;;  %2967 = vrcp.f32 %v1339_v58  ;;  %v1341_v13 = vpop.xlane.xlu1 %1340 }
 0x452   :  { %v2122_v46 = vcombine.high %v2112_v27, %v2112_v27  ;;  %v2123_v47 = vcombine.high %v2119_v25, %v2119_v25  ;;  %2456 = vst [vmem:[#allocation2 + $0x6a] sm:$0x1] %v2120_v63  ;;  %2460 = vst [vmem:[#allocation2 + $0x6e] sm:$0x1] %v2121_v42  ;;  %2969 = vrcp.f32 %v1341_v13 }
 0x453   :  { %v2041_v54 = vcombine.high %v2033_v8, %v2033_v8  ;;  %v2042_v48 = vcombine.high %v2040_v43, %v2040_v43  ;;  %v2049_v56 = vrot.slane %v2033_v8, %v3729_v51  ;;  %v2056_v50 = vrot.slane %v2040_v43, %v3729_v51  ;;  %2618 = vst.sshfl [vmem:[#allocation2 + $0x60] sm:$0x1 pattern:$0x73625140] %v2033_v8 }
 0x454   :  { %2620 = vst.sshfl [vmem:[#allocation2 + $0x64] sm:$0x1 pattern:$0x73625140] %v2040_v43  ;;  %2457 = vst [vmem:[#allocation2 + $0x6b] sm:$0x1] %v2122_v46 }
 0x455   :  { %2461 = vst [vmem:[#allocation2 + $0x6f] sm:$0x1] %v2123_v47  ;;  %v2063_v60 = vrot.slane %v2041_v54, %v3729_v51  ;;  %v2070_v59 = vrot.slane %v2042_v48, %v3729_v51  ;;  %v2071_v57 = vcombine.high %v2049_v56, %v2049_v56  ;;  %v2072_v61 = vcombine.high %v2056_v50, %v2056_v50 }
 0x456   :  { %2619 = vst.sshfl [vmem:[#allocation2 + $0x61] sm:$0x1 pattern:$0x73625140] %v2041_v54  ;;  %v2964_v23 = vpop.eup %2963 }
 0x457   :  { %2621 = vst.sshfl [vmem:[#allocation2 + $0x65] sm:$0x1 pattern:$0x73625140] %v2042_v48  ;;  %v2073_v52 = vcombine.high %v2063_v60, %v2063_v60  ;;  %v2074_v2 = vcombine.high %v2070_v59, %v2070_v59  ;;  %2448 = vst [vmem:[#allocation2 + $0x62] sm:$0x1] %v2071_v57  ;;  %v1402_v41 = vmul.f32 %v2964_v23, %v3716_v34 }
 0x458   :  { %2452 = vst [vmem:[#allocation2 + $0x66] sm:$0x1] %v2072_v61 }
 0x459   :  { %v2966_v0 = vpop.eup %2965  ;;  %2449 = vst [vmem:[#allocation2 + $0x63] sm:$0x1] %v2073_v52  ;;  %2453 = vst [vmem:[#allocation2 + $0x67] sm:$0x1] %v2074_v2 }
 0x45a   :  { %v1403_v38 = vmul.f32 %v2966_v0, %v3719_v28 }
 0x45b   :  { %v2968_v9 = vpop.eup %2967 }
 0x45c   :  { %v2970_v4 = vpop.eup %2969  ;;  %v1420_v6 = vpack.c.bf16 %v1403_v38, %v1402_v41  ;;  %v2568_v18 = vpack.c.bf16 %v1403_v38, %v1403_v38  ;;  %v1404_v26 = vmul.f32 %v2968_v9, %v3722_v53 }
 0x45d   :  { %v1405_v29 = vmul.f32 %v2970_v4, %v3725_v39 }
 0x45e   :  { %v2131_v15 = vrot.slane %v1420_v6, %v3729_v51  ;;  %v2138_v33 = vrot.slane %v2568_v18, %v3729_v51 }
 0x45f   :  { %v1421_v35 = vpack.c.bf16 %v1405_v29, %v1404_v26  ;;  %v2569_v10 = vpack.c.bf16 %v1405_v29, %v1405_v29 }
 0x460   :  { %v2139_v22 = vcombine.high %v2131_v15, %v2131_v15  ;;  %v2140_v62 = vcombine.high %v2138_v33, %v2138_v33  ;;  %v2147_v34 = vrot.slane %v2131_v15, %v3729_v51  ;;  %v2154_v28 = vrot.slane %v2138_v33, %v3729_v51  ;;  %2626 = vst.sshfl [vmem:[#allocation2 + $0x70] sm:$0x1 pattern:$0x73625140] %v2131_v15 }
 0x461   :  { %2628 = vst.sshfl [vmem:[#allocation2 + $0x74] sm:$0x1 pattern:$0x73625140] %v2138_v33  ;;  %v2180_v44 = vrot.slane %v1421_v35, %v3729_v51  ;;  %v2187_v53 = vrot.slane %v2569_v10, %v3729_v51 }
 0x462   :  { %v2161_v39 = vrot.slane %v2139_v22, %v3729_v51  ;;  %v2168_v21 = vrot.slane %v2140_v62, %v3729_v51  ;;  %v2169_v17 = vcombine.high %v2147_v34, %v2147_v34  ;;  %v2170_v40 = vcombine.high %v2154_v28, %v2154_v28  ;;  %2627 = vst.sshfl [vmem:[#allocation2 + $0x71] sm:$0x1 pattern:$0x73625140] %v2139_v22 }
 0x463   :  { %2629 = vst.sshfl [vmem:[#allocation2 + $0x75] sm:$0x1 pattern:$0x73625140] %v2140_v62  ;;  %v2188_v3 = vcombine.high %v2180_v44, %v2180_v44  ;;  %v2189_v1 = vcombine.high %v2187_v53, %v2187_v53  ;;  %v2196_v7 = vrot.slane %v2180_v44, %v3729_v51  ;;  %v2203_v36 = vrot.slane %v2187_v53, %v3729_v51 }
 0x464   :  { %2630 = vst.sshfl [vmem:[#allocation2 + $0x78] sm:$0x1 pattern:$0x73625140] %v2180_v44  ;;  %v2171_v55 = vcombine.high %v2161_v39, %v2161_v39  ;;  %v2172_v49 = vcombine.high %v2168_v21, %v2168_v21  ;;  %2464 = vst [vmem:[#allocation2 + $0x72] sm:$0x1] %v2169_v17 }
 0x465   :  { %2632 = vst.sshfl [vmem:[#allocation2 + $0x7c] sm:$0x1 pattern:$0x73625140] %v2187_v53  ;;  %2468 = vst [vmem:[#allocation2 + $0x76] sm:$0x1] %v2170_v40  ;;  %v2210_v14 = vrot.slane %v2188_v3, %v3729_v51  ;;  %v2217_v11 = vrot.slane %v2189_v1, %v3729_v51  ;;  %v2218_v24 = vcombine.high %v2196_v7, %v2196_v7 }
 0x466   :  { %v2219_v37 = vcombine.high %v2203_v36, %v2203_v36  ;;  %2631 = vst.sshfl [vmem:[#allocation2 + $0x79] sm:$0x1 pattern:$0x73625140] %v2188_v3  ;;  %2465 = vst [vmem:[#allocation2 + $0x73] sm:$0x1] %v2171_v55 }
 0x467   :  { %2633 = vst.sshfl [vmem:[#allocation2 + $0x7d] sm:$0x1 pattern:$0x73625140] %v2189_v1  ;;  %2469 = vst [vmem:[#allocation2 + $0x77] sm:$0x1] %v2172_v49  ;;  %v2220_v12 = vcombine.high %v2210_v14, %v2210_v14  ;;  %v2221_v5 = vcombine.high %v2217_v11, %v2217_v11 }
 0x468   :  { %2472 = vst [vmem:[#allocation2 + $0x7a] sm:$0x1] %v2218_v24  ;;  %2476 = vst [vmem:[#allocation2 + $0x7e] sm:$0x1] %v2219_v37 }
 0x469   :  { %2473 = vst [vmem:[#allocation2 + $0x7b] sm:$0x1] %v2220_v12  ;;  %2477 = vst [vmem:[#allocation2 + $0x7f] sm:$0x1] %v2221_v5 }
 0x46a   :  { %2482 = vsyncadd [#allocation3], 2032  ;;  %s2997_s6 = smov [#allocation2]  }
 0x46b   :  { %s2483_s22 = sshll.u32 %s2997_s6, 4  ;;  %s2484_s22 = int_to_ptr.vmem [resolvable:$true] %s2483_s22 }
 0x46c   :  { %s2971_s23 = scalar_lea.vmem %s2484_s22, 16  ;;  %s2975_s24 = scalar_lea.vmem %s2484_s22, 2048 }
 0x46d   :  { %p2972_p0 = scmp.ne.s32.totalorder %s2484_s22, %s2971_s23  ;;  %p2976_p1 = scmp.lt.s32.totalorder %s2484_s22, %s2484_s22 }
 0x46e   :  { %p2977_p2 = scmp.lt.s32.totalorder %s2975_s24, %s2971_s23 }
 0x470   :  { %p2978_p3 = por %p2977_p2, %p2976_p1 }
 0x472   :  { %p2979_p4 = pnand %p2978_p3, %p2972_p0 }
 0x474   :  { %2982 = shalt.err (!%p2979_p4)
}
 0x475   :  { %s2983_s26 = scalar_lea.hbm %s3878_s7, 16 }
 0x476   :  { %p2984_p5 = scmp.ne.s32.totalorder %s3878_s7, %s2983_s26  ;;  %p2987_p6 = scmp.lt.u32.totalorder %s2983_s26, %s3878_s7 }
 0x478   :  { %p2989_p7 = pnand %p2987_p6, %p2984_p5 }
 0x47a   :  { %2992 = shalt.err (!%p2989_p7)
}
 0x47b   :  { %s2998_s8 = smov 16   ;;  %s2999_s9 = smov 1  }
 0x47c   :  { %2489 = dma.vmem_to_hbm [thread:$0]  %s2484_s22, 16, %s3878_s7, [#allocation3], %s2998_s8, %s2998_s8, %s2999_s9  }
 0x47d   :  { %2993 = dma.done.wait [#allocation3], 2048  }
 0x47e   :  { %2994 = vsyncadd [#allocation3], 4294965248 }
 0x47f   :  { %2493 = vsyncpa [#allocation3], 1 }

</bundles_post_ra>
